<compile_context>
chip_gen: v7x
topology: tpu7x:2x2x1
jax: 0.10.0
libtpu: 0.0.40
codegen_flags: <defaults>
</compile_context>

<pallas_src>
import functools

import jax
import jax.numpy as jnp
from jax import lax
from jax.experimental import pallas as pl
from jax.experimental.pallas import tpu as pltpu


# ----------------------------------------------------------------------------
# Fused kernel: one grid step = (one image) x (one strip of `th` output rows)
# ----------------------------------------------------------------------------
def _fused_block_kernel(*refs, stride, col_off, has_expand, use_res):
    if has_expand:
        (x_ref, mask_ref, w1_ref, s1_ref, b1_ref,
         w2_ref, s2_ref, b2_ref, w3_ref, s3_ref, b3_ref,
         o_ref, hid_ref) = refs
        th_in = hid_ref.shape[0]
    else:
        (x_ref, w2_ref, s2_ref, b2_ref,
         w3_ref, s3_ref, b3_ref, o_ref) = refs

    hp, wd, cin = x_ref.shape            # padded (col-deinterleaved if s=2) image
    h_img = hp - 2                       # number of real image rows
    th, wo, cout = o_ref.shape
    hidden = w2_ref.shape[-1]
    f32 = jnp.float32

    r = pl.program_id(1)
    row0 = pl.multiple_of(r * (th * stride), th * stride)   # first padded input row

    w2 = w2_ref[...]                     # (3, 3, hidden) f32
    s2 = s2_ref[...]; b2 = b2_ref[...]
    w3 = w3_ref[...]                     # (hidden, cout) compute dtype
    s3 = s3_ref[...]; b3 = b3_ref[...]

    # -- stage 1: 1x1 expand conv + BN + ReLU6, one padded input row at a time;
    #    the hidden activation only ever lives in the VMEM scratch strip.
    if has_expand:
        w1 = w1_ref[...]
        s1 = s1_ref[...]; b1 = b1_ref[...]
        cmask = mask_ref[...]            # (wd, 1) f32, zeros at the padding cols
        for i in range(th_in):
            pr = row0 + i                # padded input row index
            h = jnp.dot(x_ref[pr], w1, preferred_element_type=f32)
            h = jnp.clip(h * s1 + b1, 0.0, 6.0)
            # Zero the halo (padding rows/cols) so the depthwise conv sees true
            # zero padding rather than relu6(bias): one cheap mask multiply.
            row_ok = jnp.logical_and(pr >= 1, pr <= h_img).astype(f32)
            h = h * (cmask * row_ok)
            hid_ref[i, :, :] = h.astype(hid_ref.dtype)

    # -- stage 2 + 3 per output row: 3x3 depthwise + BN + ReLU6, 1x1 project
    #    + BN (+ residual) + final ReLU6 (`self.fw`).
    for i in range(th):
        acc = jnp.zeros((wo, hidden), f32)
        for kh in range(3):
            t = i * stride + kh          # strip-local input row (static)
            for kw in range(3):
                if has_expand:
                    tap = hid_ref[t, pl.ds(col_off[kw], wo), :]
                else:
                    # expand_ratio == 1: tap the (truly zero-padded) input.
                    tap = x_ref[row0 + t, pl.ds(col_off[kw], wo), :]
                acc = acc + tap.astype(f32) * w2[kh, kw]
        d = jnp.clip(acc * s2 + b2, 0.0, 6.0)
        y = jnp.dot(d.astype(w3.dtype), w3, preferred_element_type=f32)
        y = y * s3 + b3
        if use_res:
            # stride == 1 and Cin == Cout; residual rows come straight from the
            # VMEM-resident padded input block.
            y = y + x_ref[row0 + 1 + i, pl.ds(1, wo), :].astype(f32)
        y = jnp.clip(y, 0.0, 6.0)
        o_ref[i, :, :] = y.astype(o_ref.dtype)


# ----------------------------------------------------------------------------
# Wrappers
# ----------------------------------------------------------------------------
def _vmem_capacity_bytes():
    try:
        return int(pltpu.get_tpu_info().vmem_capacity_bytes)
    except Exception:
        return 64 * 1024 * 1024          # conservative fallback (v7x per-core)


def _pick_block_rows(ho, budget_bytes, estimate, max_rows=32):
    """Largest divisor of Ho (<= max_rows) whose per-step VMEM estimate fits."""
    best = 1
    for th in range(1, min(ho, max_rows) + 1):
        if ho % th == 0 and estimate(th) <= budget_bytes:
            best = th
    return best


def inverted_residual_nhwc(x, params, *, stride, expand_ratio, use_res_connect,
                           block_rows=None, compute_dtype=jnp.bfloat16):
    """Fused InvertedResidual forward. x: (N, H, W, Cin) -> (N, Ho, Wo, Cout)."""
    N, H, W, Cin = x.shape
    s = stride
    Ho = (H - 1) // s + 1
    Wo = (W - 1) // s + 1
    has_expand = expand_ratio != 1
    if has_expand:
        w1, s1, b1 = params["expand"]
        hidden = w1.shape[1]
    else:
        hidden = Cin
    w2, s2, b2 = params["dw"]
    w3, s3, b3 = params["project"]
    Cout = w3.shape[1]
    if use_res_connect:
        assert s == 1 and Cin == Cout, "residual needs stride 1 and inp == oup"

    cdt = jnp.dtype(compute_dtype)
    f32 = jnp.float32
    cbytes = cdt.itemsize

    # Only the small Cin-channel input is zero-padded (the expand_ratio-times
    # larger hidden activation never exists in HBM).
    xp = jnp.pad(x.astype(cdt), ((0, 0), (1, 1), (1, 1), (0, 0)))
    Wd = W + 2
    if s == 2:
        # Column-deinterleave in the wrapper (XLA) so every stride-2 depthwise
        # column tap becomes a contiguous slice inside the kernel.
        xp = jnp.concatenate([xp[:, :, 0::2, :], xp[:, :, 1::2, :]], axis=2)
        ne = (W + 3) // 2                                # number of even padded cols
        col_off = (0, ne, 1)                             # taps kw = 0, 1, 2
        if (W + 1) % 2 == 0:
            halo_cols = (0, (W + 1) // 2)
        else:
            halo_cols = (0, ne + W // 2)
    else:
        col_off = (0, 1, 2)
        halo_cols = (0, W + 1)

    # Generation-aware VMEM budgeting (v5e/v6e: 128 MiB, v7x: 64 MiB per core).
    vmem_cap = _vmem_capacity_bytes()
    vmem_limit = min(max(3 * vmem_cap // 4, 32 << 20), 112 << 20)

    def vmem_estimate(th):
        th_in_ = (th - 1) * s + 3
        est = 2 * (H + 2) * Wd * Cin * cbytes                 # image block (2 bufs)
        est += 2 * th * Wo * Cout * cbytes                    # output strip (2 bufs)
        est += 2 * (Cin * hidden + hidden * Cout) * cbytes    # 1x1 weights
        est += 2 * (13 * hidden + 2 * Cout + Wd) * 4          # dw weights, BN, mask
        if has_expand:
            est += th_in_ * Wd * hidden * cbytes              # hidden VMEM scratch
        return est + (1 << 20)                                # slack

    if (block_rows is not None and Ho % int(block_rows) == 0
            and vmem_estimate(int(block_rows)) <= vmem_limit):
        th = int(block_rows)
    else:
        th = _pick_block_rows(Ho, vmem_limit, vmem_estimate)
    th_in = (th - 1) * s + 3
    n_strips = Ho // th

    row = lambda v: v.reshape(1, -1).astype(f32)

    def const(shape):
        zeros = (0,) * len(shape)
        return pl.BlockSpec(shape, lambda n, r: zeros)

    # The whole padded image is one (revisited) block: DMA'd once per image n,
    # reused across all row strips r.
    in_specs = [pl.BlockSpec((None, H + 2, Wd, Cin), lambda n, r: (n, 0, 0, 0))]
    args = [xp]
    if has_expand:
        colmask = (jnp.ones((Wd, 1), f32)
                   .at[halo_cols[0], 0].set(0.0)
                   .at[halo_cols[1], 0].set(0.0))
        in_specs += [const((Wd, 1)),
                     const((Cin, hidden)), const((1, hidden)), const((1, hidden))]
        args += [colmask, w1.astype(cdt), row(s1), row(b1)]
    in_specs += [const((3, 3, hidden)), const((1, hidden)), const((1, hidden)),
                 const((hidden, Cout)), const((1, Cout)), const((1, Cout))]
    args += [w2.astype(f32), row(s2), row(b2), w3.astype(cdt), row(s3), row(b3)]

    scratch = [pltpu.VMEM((th_in, Wd, hidden), cdt)] if has_expand else []

    kernel = functools.partial(_fused_block_kernel, stride=s, col_off=col_off,
                               has_expand=has_expand, use_res=use_res_connect)

    return pl.pallas_call(
        kernel,
        grid=(N, n_strips),
        in_specs=in_specs,
        out_specs=pl.BlockSpec((None, th, Wo, Cout), lambda n, r: (n, r, 0, 0)),
        out_shape=jax.ShapeDtypeStruct((N, Ho, Wo, Cout), cdt),
        scratch_shapes=scratch,
        compiler_params=pltpu.CompilerParams(
            dimension_semantics=("parallel", "parallel"),
            vmem_limit_bytes=int(vmem_limit)),
    )(*args)


def inverted_residual(x_nchw, params, *, stride, expand_ratio, use_res_connect,
                      block_rows=None, compute_dtype=jnp.bfloat16):
    """PyTorch-convention wrapper: NCHW in / NCHW out (NHWC inside)."""
    x = jnp.transpose(x_nchw, (0, 2, 3, 1))
    y = inverted_residual_nhwc(x, params, stride=stride, expand_ratio=expand_ratio,
                               use_res_connect=use_res_connect,
                               block_rows=block_rows, compute_dtype=compute_dtype)
    return jnp.transpose(y, (0, 3, 1, 2))


# ----------------------------------------------------------------------------
# Pure-JAX reference (mirrors the kernel's cast points; returns f32)
# ----------------------------------------------------------------------------
def inverted_residual_ref(x_nchw, params, *, stride, expand_ratio, use_res_connect,
                          compute_dtype=jnp.bfloat16):
    cdt = jnp.dtype(compute_dtype)
    f32 = jnp.float32
    relu6 = lambda v: jnp.clip(v, 0.0, 6.0)
    x = jnp.transpose(x_nchw, (0, 2, 3, 1)).astype(cdt)
    if expand_ratio != 1:
        w1, s1, b1 = params["expand"]
        h = jnp.einsum("nhwi,io->nhwo", x, w1.astype(cdt),
                       preferred_element_type=f32)
        h = relu6(h * s1 + b1).astype(cdt)      # hidden storage rounding
    else:
        h = x
    w2, s2, b2 = params["dw"]
    C = h.shape[-1]
    d = lax.conv_general_dilated(
        h.astype(f32), w2.reshape(3, 3, 1, C).astype(f32),
        (stride, stride), ((1, 1), (1, 1)),
        dimension_numbers=("NHWC", "HWIO", "NHWC"), feature_group_count=C)
    d = relu6(d * s2 + b2)
    w3, s3, b3 = params["project"]
    y = jnp.einsum("nhwi,io->nhwo", d.astype(cdt), w3.astype(cdt),
                   preferred_element_type=f32)
    y = y * s3 + b3
    if use_res_connect:
        y = y + x.astype(f32)
    y = relu6(y)                                # `self.fw`
    return jnp.transpose(y, (0, 3, 1, 2))


# ----------------------------------------------------------------------------
# Main
# ----------------------------------------------------------------------------
if __name__ == "__main__":
    key = jax.random.PRNGKey(0)

    def bn_params(kg, kb, km, kv, c, eps=1e-5):
        gamma = 1.0 + 0.1 * jax.random.normal(kg, (c,), jnp.float32)
        beta = 0.1 * jax.random.normal(kb, (c,), jnp.float32)
        mean = 0.1 * jax.random.normal(km, (c,), jnp.float32)
        var = 0.5 + jnp.abs(jax.random.normal(kv, (c,), jnp.float32))
        scale = gamma / jnp.sqrt(var + eps)
        bias = beta - mean * scale
        return scale, bias

    def make_params(k, inp, oup, expand_ratio):
        hidden = int(inp * expand_ratio)
        ks = jax.random.split(k, 15)
        params = {}
        if expand_ratio != 1:
            w_expand_t = 0.1 * jax.random.normal(ks[0], (hidden, inp, 1, 1), jnp.float32)
            s1, b1 = bn_params(ks[3], ks[4], ks[5], ks[6], hidden)
            params["expand"] = (jnp.transpose(w_expand_t[:, :, 0, 0], (1, 0)), s1, b1)
        w_dw_t = 0.1 * jax.random.normal(ks[1], (hidden, 1, 3, 3), jnp.float32)
        w_proj_t = 0.1 * jax.random.normal(ks[2], (oup, hidden, 1, 1), jnp.float32)
        s2, b2 = bn_params(ks[7], ks[8], ks[9], ks[10], hidden)
        s3, b3 = bn_params(ks[11], ks[12], ks[13], ks[14], oup)
        params["dw"] = (jnp.transpose(w_dw_t[:, 0, :, :], (1, 2, 0)), s2, b2)
        params["project"] = (jnp.transpose(w_proj_t[:, :, 0, 0], (1, 0)), s3, b3)
        return params

    bf16, f32 = jnp.bfloat16, jnp.float32
    configs = [
        # (inp, oup, stride, expand_ratio, N, H, W, block_rows, compute_dtype, tol)
        (32, 32, 1, 4, 2, 16, 16, 4, bf16, 4e-2),     # residual, hidden=128, 4 strips
        (16, 16, 1, 1, 2, 16, 16, None, bf16, 4e-2),  # expand_ratio==1 (dw-first)
        (16, 24, 2, 6, 2, 16, 16, 4, bf16, 4e-2),     # stride-2 (deinterleaved cols)
        (32, 32, 1, 4, 2, 16, 16, 4, f32, 1e-4),      # exact f32 semantics check
    ]

    for idx, (inp, oup, stride, expand_ratio, N, H, W, br, cdt, tol) in enumerate(configs):
        use_res_connect = (stride == 1) and (inp == oup)
        cfg_key = jax.random.fold_in(key, idx)
        kp, kx = jax.random.split(cfg_key)
        params = make_params(kp, inp, oup, expand_ratio)
        x = jax.random.normal(kx, (N, inp, H, W), jnp.float32)

        fwd = jax.jit(functools.partial(
            inverted_residual, stride=stride, expand_ratio=expand_ratio,
            use_res_connect=use_res_connect, block_rows=br, compute_dtype=cdt))
        out = jax.block_until_ready(fwd(x, params))

        ref = inverted_residual_ref(
            x, params, stride=stride, expand_ratio=expand_ratio,
            use_res_connect=use_res_connect, compute_dtype=cdt)

        Ho = (H - 1) // stride + 1
        Wo = (W - 1) // stride + 1
        assert out.shape == (N, oup, Ho, Wo), out.shape
        assert out.dtype == jnp.dtype(cdt), out.dtype
        max_err = float(jnp.max(jnp.abs(out.astype(jnp.float32) - ref)))
        assert max_err < tol, f"config {idx}: max abs error {max_err} (tol {tol})"

    print("KERNEL_OK")
</pallas_src>

<mosaic_0001>
module attributes {stable_mosaic.version = 11 : i64} {
  func.func @_fused_block_kernel(%arg0: i32, %arg1: i32, %arg2: memref<1x18x18x32xbf16, #tpu.memory_space<vmem>>, %arg3: memref<18x1xf32, #tpu.memory_space<vmem>>, %arg4: memref<32x128xbf16, #tpu.memory_space<vmem>>, %arg5: memref<1x128xf32, #tpu.memory_space<vmem>>, %arg6: memref<1x128xf32, #tpu.memory_space<vmem>>, %arg7: memref<3x3x128xf32, #tpu.memory_space<vmem>>, %arg8: memref<1x128xf32, #tpu.memory_space<vmem>>, %arg9: memref<1x128xf32, #tpu.memory_space<vmem>>, %arg10: memref<128x32xbf16, #tpu.memory_space<vmem>>, %arg11: memref<1x32xf32, #tpu.memory_space<vmem>>, %arg12: memref<1x32xf32, #tpu.memory_space<vmem>>, %arg13: memref<1x4x16x32xbf16, #tpu.memory_space<vmem>>, %arg14: memref<6x18x128xbf16, #tpu.memory_space<vmem>>) attributes {dimension_semantics = [#tpu.dimension_semantics<parallel>, #tpu.dimension_semantics<parallel>], iteration_bounds = array<i64: 2, 4>, scalar_prefetch = 0 : i64, scratch_operands = 1 : i64, tpu.core_type = #tpu.core_type<tc>, window_params = [{transform_indices = @transform_0, window_bounds = array<i64: 1, 18, 18, 32>}, {pipeline_mode = #tpu.pipeline_mode<synchronous>, transform_indices = @transform_1, window_bounds = array<i64: 18, 1>}, {pipeline_mode = #tpu.pipeline_mode<synchronous>, transform_indices = @transform_2, window_bounds = array<i64: 32, 128>}, {pipeline_mode = #tpu.pipeline_mode<synchronous>, transform_indices = @transform_3, window_bounds = array<i64: 1, 128>}, {pipeline_mode = #tpu.pipeline_mode<synchronous>, transform_indices = @transform_4, window_bounds = array<i64: 1, 128>}, {pipeline_mode = #tpu.pipeline_mode<synchronous>, transform_indices = @transform_5, window_bounds = array<i64: 3, 3, 128>}, {pipeline_mode = #tpu.pipeline_mode<synchronous>, transform_indices = @transform_6, window_bounds = array<i64: 1, 128>}, {pipeline_mode = #tpu.pipeline_mode<synchronous>, transform_indices = @transform_7, window_bounds = array<i64: 1, 128>}, {pipeline_mode = #tpu.pipeline_mode<synchronous>, transform_indices = @transform_8, window_bounds = array<i64: 128, 32>}, {pipeline_mode = #tpu.pipeline_mode<synchronous>, transform_indices = @transform_9, window_bounds = array<i64: 1, 32>}, {pipeline_mode = #tpu.pipeline_mode<synchronous>, transform_indices = @transform_10, window_bounds = array<i64: 1, 32>}, {transform_indices = @transform_11, window_bounds = array<i64: 1, 4, 16, 32>}]} {
    %c4_i32 = arith.constant 4 : i32
    %0 = arith.muli %arg1, %c4_i32 : i32
    %1 = tpu.assume_multiple %0, 4 : i32
    %c0 = arith.constant 0 : index
    %c0_0 = arith.constant 0 : index
    %c0_1 = arith.constant 0 : index
    %2 = vector.load %arg7[%c0, %c0_0, %c0_1] : memref<3x3x128xf32, #tpu.memory_space<vmem>>, vector<3x3x128xf32>
    %c0_2 = arith.constant 0 : index
    %c0_3 = arith.constant 0 : index
    %3 = vector.load %arg8[%c0_2, %c0_3] : memref<1x128xf32, #tpu.memory_space<vmem>>, vector<1x128xf32>
    %c0_4 = arith.constant 0 : index
    %c0_5 = arith.constant 0 : index
    %4 = vector.load %arg9[%c0_4, %c0_5] : memref<1x128xf32, #tpu.memory_space<vmem>>, vector<1x128xf32>
    %c0_6 = arith.constant 0 : index
    %c0_7 = arith.constant 0 : index
    %5 = vector.load %arg10[%c0_6, %c0_7] : memref<128x32xbf16, #tpu.memory_space<vmem>>, vector<128x32xbf16>
    %c0_8 = arith.constant 0 : index
    %c0_9 = arith.constant 0 : index
    %6 = vector.load %arg11[%c0_8, %c0_9] : memref<1x32xf32, #tpu.memory_space<vmem>>, vector<1x32xf32>
    %c0_10 = arith.constant 0 : index
    %c0_11 = arith.constant 0 : index
    %7 = vector.load %arg12[%c0_10, %c0_11] : memref<1x32xf32, #tpu.memory_space<vmem>>, vector<1x32xf32>
    %c0_12 = arith.constant 0 : index
    %c0_13 = arith.constant 0 : index
    %8 = vector.load %arg4[%c0_12, %c0_13] : memref<32x128xbf16, #tpu.memory_space<vmem>>, vector<32x128xbf16>
    %c0_14 = arith.constant 0 : index
    %c0_15 = arith.constant 0 : index
    %9 = vector.load %arg5[%c0_14, %c0_15] : memref<1x128xf32, #tpu.memory_space<vmem>>, vector<1x128xf32>
    %c0_16 = arith.constant 0 : index
    %c0_17 = arith.constant 0 : index
    %10 = vector.load %arg6[%c0_16, %c0_17] : memref<1x128xf32, #tpu.memory_space<vmem>>, vector<1x128xf32>
    %c0_18 = arith.constant 0 : index
    %c0_19 = arith.constant 0 : index
    %11 = vector.load %arg3[%c0_18, %c0_19] : memref<18x1xf32, #tpu.memory_space<vmem>>, vector<18x1xf32>
    %c0_i32 = arith.constant 0 : i32
    %12 = arith.addi %1, %c0_i32 : i32
    %c0_20 = arith.constant 0 : index
    %13 = arith.index_cast %12 : i32 to index
    %c0_21 = arith.constant 0 : index
    %c0_22 = arith.constant 0 : index
    %14 = vector.load %arg2[%c0_20, %13, %c0_21, %c0_22] : memref<1x18x18x32xbf16, #tpu.memory_space<vmem>>, vector<1x1x18x32xbf16>
    %15 = vector.shape_cast %14 : vector<1x1x18x32xbf16> to vector<18x32xbf16>
    %cst = arith.constant dense<0.000000e+00> : vector<18x128xf32>
    %16 = tpu.matmul %15, %8, %cst {dimension_numbers = #tpu.dot_dimension_numbers<[1], [0], [0], [1], [0, 0, 1, 1], [], []>} : vector<18x32xbf16>, vector<32x128xbf16>, vector<18x128xf32> -> vector<18x128xf32>
    %17 = vector.broadcast %9 : vector<1x128xf32> to vector<18x128xf32>
    %18 = arith.mulf %16, %17 : vector<18x128xf32>
    %19 = vector.broadcast %10 : vector<1x128xf32> to vector<18x128xf32>
    %20 = arith.addf %18, %19 : vector<18x128xf32>
    %cst_23 = arith.constant 0.000000e+00 : f32
    %cst_24 = arith.constant 6.000000e+00 : f32
    %21 = vector.broadcast %cst_23 : f32 to vector<18x128xf32>
    %22 = arith.maximumf %21, %20 : vector<18x128xf32>
    %23 = vector.broadcast %cst_24 : f32 to vector<18x128xf32>
    %24 = arith.minimumf %23, %22 : vector<18x128xf32>
    %c1_i32 = arith.constant 1 : i32
    %25 = arith.cmpi sge, %12, %c1_i32 : i32
    %c16_i32 = arith.constant 16 : i32
    %26 = arith.cmpi sle, %12, %c16_i32 : i32
    %27 = arith.andi %25, %26 : i1
    %28 = arith.extui %27 : i1 to i32
    %29 = arith.sitofp %28 : i32 to f32
    %30 = vector.broadcast %29 : f32 to vector<18x1xf32>
    %31 = arith.mulf %11, %30 : vector<18x1xf32>
    %32 = vector.broadcast %31 : vector<18x1xf32> to vector<18x128xf32>
    %33 = arith.mulf %24, %32 : vector<18x128xf32>
    %34 = arith.truncf %33 : vector<18x128xf32> to vector<18x128xbf16>
    %c0_25 = arith.constant 0 : index
    %c0_26 = arith.constant 0 : index
    %c0_27 = arith.constant 0 : index
    %35 = vector.load %arg14[%c0_25, %c0_26, %c0_27] : memref<6x18x128xbf16, #tpu.memory_space<vmem>>, vector<1x18x128xbf16>
    %36 = vector.shape_cast %35 : vector<1x18x128xbf16> to vector<18x128xbf16>
    %37 = vector.shape_cast %34 : vector<18x128xbf16> to vector<1x18x128xbf16>
    tpu.vector_store %arg14[%c0_25, %c0_26, %c0_27], %37 {strides = array<i32>} : memref<6x18x128xbf16, #tpu.memory_space<vmem>>, vector<1x18x128xbf16>,
    %c1_i32_28 = arith.constant 1 : i32
    %38 = arith.addi %1, %c1_i32_28 : i32
    %c0_29 = arith.constant 0 : index
    %39 = arith.index_cast %38 : i32 to index
    %c0_30 = arith.constant 0 : index
    %c0_31 = arith.constant 0 : index
    %40 = vector.load %arg2[%c0_29, %39, %c0_30, %c0_31] : memref<1x18x18x32xbf16, #tpu.memory_space<vmem>>, vector<1x1x18x32xbf16>
    %41 = vector.shape_cast %40 : vector<1x1x18x32xbf16> to vector<18x32xbf16>
    %cst_32 = arith.constant dense<0.000000e+00> : vector<18x128xf32>
    %42 = tpu.matmul %41, %8, %cst_32 {dimension_numbers = #tpu.dot_dimension_numbers<[1], [0], [0], [1], [0, 0, 1, 1], [], []>} : vector<18x32xbf16>, vector<32x128xbf16>, vector<18x128xf32> -> vector<18x128xf32>
    %43 = vector.broadcast %9 : vector<1x128xf32> to vector<18x128xf32>
    %44 = arith.mulf %42, %43 : vector<18x128xf32>
    %45 = vector.broadcast %10 : vector<1x128xf32> to vector<18x128xf32>
    %46 = arith.addf %44, %45 : vector<18x128xf32>
    %cst_33 = arith.constant 0.000000e+00 : f32
    %cst_34 = arith.constant 6.000000e+00 : f32
    %47 = vector.broadcast %cst_33 : f32 to vector<18x128xf32>
    %48 = arith.maximumf %47, %46 : vector<18x128xf32>
    %49 = vector.broadcast %cst_34 : f32 to vector<18x128xf32>
    %50 = arith.minimumf %49, %48 : vector<18x128xf32>
    %c1_i32_35 = arith.constant 1 : i32
    %51 = arith.cmpi sge, %38, %c1_i32_35 : i32
    %c16_i32_36 = arith.constant 16 : i32
    %52 = arith.cmpi sle, %38, %c16_i32_36 : i32
    %53 = arith.andi %51, %52 : i1
    %54 = arith.extui %53 : i1 to i32
    %55 = arith.sitofp %54 : i32 to f32
    %56 = vector.broadcast %55 : f32 to vector<18x1xf32>
    %57 = arith.mulf %11, %56 : vector<18x1xf32>
    %58 = vector.broadcast %57 : vector<18x1xf32> to vector<18x128xf32>
    %59 = arith.mulf %50, %58 : vector<18x128xf32>
    %60 = arith.truncf %59 : vector<18x128xf32> to vector<18x128xbf16>
    %c1 = arith.constant 1 : index
    %c0_37 = arith.constant 0 : index
    %c0_38 = arith.constant 0 : index
    %61 = vector.load %arg14[%c1, %c0_37, %c0_38] : memref<6x18x128xbf16, #tpu.memory_space<vmem>>, vector<1x18x128xbf16>
    %62 = vector.shape_cast %61 : vector<1x18x128xbf16> to vector<18x128xbf16>
    %63 = vector.shape_cast %60 : vector<18x128xbf16> to vector<1x18x128xbf16>
    tpu.vector_store %arg14[%c1, %c0_37, %c0_38], %63 {strides = array<i32>} : memref<6x18x128xbf16, #tpu.memory_space<vmem>>, vector<1x18x128xbf16>,
    %c2_i32 = arith.constant 2 : i32
    %64 = arith.addi %1, %c2_i32 : i32
    %c0_39 = arith.constant 0 : index
    %65 = arith.index_cast %64 : i32 to index
    %c0_40 = arith.constant 0 : index
    %c0_41 = arith.constant 0 : index
    %66 = vector.load %arg2[%c0_39, %65, %c0_40, %c0_41] : memref<1x18x18x32xbf16, #tpu.memory_space<vmem>>, vector<1x1x18x32xbf16>
    %67 = vector.shape_cast %66 : vector<1x1x18x32xbf16> to vector<18x32xbf16>
    %cst_42 = arith.constant dense<0.000000e+00> : vector<18x128xf32>
    %68 = tpu.matmul %67, %8, %cst_42 {dimension_numbers = #tpu.dot_dimension_numbers<[1], [0], [0], [1], [0, 0, 1, 1], [], []>} : vector<18x32xbf16>, vector<32x128xbf16>, vector<18x128xf32> -> vector<18x128xf32>
    %69 = vector.broadcast %9 : vector<1x128xf32> to vector<18x128xf32>
    %70 = arith.mulf %68, %69 : vector<18x128xf32>
    %71 = vector.broadcast %10 : vector<1x128xf32> to vector<18x128xf32>
    %72 = arith.addf %70, %71 : vector<18x128xf32>
    %cst_43 = arith.constant 0.000000e+00 : f32
    %cst_44 = arith.constant 6.000000e+00 : f32
    %73 = vector.broadcast %cst_43 : f32 to vector<18x128xf32>
    %74 = arith.maximumf %73, %72 : vector<18x128xf32>
    %75 = vector.broadcast %cst_44 : f32 to vector<18x128xf32>
    %76 = arith.minimumf %75, %74 : vector<18x128xf32>
    %c1_i32_45 = arith.constant 1 : i32
    %77 = arith.cmpi sge, %64, %c1_i32_45 : i32
    %c16_i32_46 = arith.constant 16 : i32
    %78 = arith.cmpi sle, %64, %c16_i32_46 : i32
    %79 = arith.andi %77, %78 : i1
    %80 = arith.extui %79 : i1 to i32
    %81 = arith.sitofp %80 : i32 to f32
    %82 = vector.broadcast %81 : f32 to vector<18x1xf32>
    %83 = arith.mulf %11, %82 : vector<18x1xf32>
    %84 = vector.broadcast %83 : vector<18x1xf32> to vector<18x128xf32>
    %85 = arith.mulf %76, %84 : vector<18x128xf32>
    %86 = arith.truncf %85 : vector<18x128xf32> to vector<18x128xbf16>
    %c2 = arith.constant 2 : index
    %c0_47 = arith.constant 0 : index
    %c0_48 = arith.constant 0 : index
    %87 = vector.load %arg14[%c2, %c0_47, %c0_48] : memref<6x18x128xbf16, #tpu.memory_space<vmem>>, vector<1x18x128xbf16>
    %88 = vector.shape_cast %87 : vector<1x18x128xbf16> to vector<18x128xbf16>
    %89 = vector.shape_cast %86 : vector<18x128xbf16> to vector<1x18x128xbf16>
    tpu.vector_store %arg14[%c2, %c0_47, %c0_48], %89 {strides = array<i32>} : memref<6x18x128xbf16, #tpu.memory_space<vmem>>, vector<1x18x128xbf16>,
    %c3_i32 = arith.constant 3 : i32
    %90 = arith.addi %1, %c3_i32 : i32
    %c0_49 = arith.constant 0 : index
    %91 = arith.index_cast %90 : i32 to index
    %c0_50 = arith.constant 0 : index
    %c0_51 = arith.constant 0 : index
    %92 = vector.load %arg2[%c0_49, %91, %c0_50, %c0_51] : memref<1x18x18x32xbf16, #tpu.memory_space<vmem>>, vector<1x1x18x32xbf16>
    %93 = vector.shape_cast %92 : vector<1x1x18x32xbf16> to vector<18x32xbf16>
    %cst_52 = arith.constant dense<0.000000e+00> : vector<18x128xf32>
    %94 = tpu.matmul %93, %8, %cst_52 {dimension_numbers = #tpu.dot_dimension_numbers<[1], [0], [0], [1], [0, 0, 1, 1], [], []>} : vector<18x32xbf16>, vector<32x128xbf16>, vector<18x128xf32> -> vector<18x128xf32>
    %95 = vector.broadcast %9 : vector<1x128xf32> to vector<18x128xf32>
    %96 = arith.mulf %94, %95 : vector<18x128xf32>
    %97 = vector.broadcast %10 : vector<1x128xf32> to vector<18x128xf32>
    %98 = arith.addf %96, %97 : vector<18x128xf32>
    %cst_53 = arith.constant 0.000000e+00 : f32
    %cst_54 = arith.constant 6.000000e+00 : f32
    %99 = vector.broadcast %cst_53 : f32 to vector<18x128xf32>
    %100 = arith.maximumf %99, %98 : vector<18x128xf32>
    %101 = vector.broadcast %cst_54 : f32 to vector<18x128xf32>
    %102 = arith.minimumf %101, %100 : vector<18x128xf32>
    %c1_i32_55 = arith.constant 1 : i32
    %103 = arith.cmpi sge, %90, %c1_i32_55 : i32
    %c16_i32_56 = arith.constant 16 : i32
    %104 = arith.cmpi sle, %90, %c16_i32_56 : i32
    %105 = arith.andi %103, %104 : i1
    %106 = arith.extui %105 : i1 to i32
    %107 = arith.sitofp %106 : i32 to f32
    %108 = vector.broadcast %107 : f32 to vector<18x1xf32>
    %109 = arith.mulf %11, %108 : vector<18x1xf32>
    %110 = vector.broadcast %109 : vector<18x1xf32> to vector<18x128xf32>
    %111 = arith.mulf %102, %110 : vector<18x128xf32>
    %112 = arith.truncf %111 : vector<18x128xf32> to vector<18x128xbf16>
    %c3 = arith.constant 3 : index
    %c0_57 = arith.constant 0 : index
    %c0_58 = arith.constant 0 : index
    %113 = vector.load %arg14[%c3, %c0_57, %c0_58] : memref<6x18x128xbf16, #tpu.memory_space<vmem>>, vector<1x18x128xbf16>
    %114 = vector.shape_cast %113 : vector<1x18x128xbf16> to vector<18x128xbf16>
    %115 = vector.shape_cast %112 : vector<18x128xbf16> to vector<1x18x128xbf16>
    tpu.vector_store %arg14[%c3, %c0_57, %c0_58], %115 {strides = array<i32>} : memref<6x18x128xbf16, #tpu.memory_space<vmem>>, vector<1x18x128xbf16>,
    %c4_i32_59 = arith.constant 4 : i32
    %116 = arith.addi %1, %c4_i32_59 : i32
    %c0_60 = arith.constant 0 : index
    %117 = arith.index_cast %116 : i32 to index
    %c0_61 = arith.constant 0 : index
    %c0_62 = arith.constant 0 : index
    %118 = vector.load %arg2[%c0_60, %117, %c0_61, %c0_62] : memref<1x18x18x32xbf16, #tpu.memory_space<vmem>>, vector<1x1x18x32xbf16>
    %119 = vector.shape_cast %118 : vector<1x1x18x32xbf16> to vector<18x32xbf16>
    %cst_63 = arith.constant dense<0.000000e+00> : vector<18x128xf32>
    %120 = tpu.matmul %119, %8, %cst_63 {dimension_numbers = #tpu.dot_dimension_numbers<[1], [0], [0], [1], [0, 0, 1, 1], [], []>} : vector<18x32xbf16>, vector<32x128xbf16>, vector<18x128xf32> -> vector<18x128xf32>
    %121 = vector.broadcast %9 : vector<1x128xf32> to vector<18x128xf32>
    %122 = arith.mulf %120, %121 : vector<18x128xf32>
    %123 = vector.broadcast %10 : vector<1x128xf32> to vector<18x128xf32>
    %124 = arith.addf %122, %123 : vector<18x128xf32>
    %cst_64 = arith.constant 0.000000e+00 : f32
    %cst_65 = arith.constant 6.000000e+00 : f32
    %125 = vector.broadcast %cst_64 : f32 to vector<18x128xf32>
    %126 = arith.maximumf %125, %124 : vector<18x128xf32>
    %127 = vector.broadcast %cst_65 : f32 to vector<18x128xf32>
    %128 = arith.minimumf %127, %126 : vector<18x128xf32>
    %c1_i32_66 = arith.constant 1 : i32
    %129 = arith.cmpi sge, %116, %c1_i32_66 : i32
    %c16_i32_67 = arith.constant 16 : i32
    %130 = arith.cmpi sle, %116, %c16_i32_67 : i32
    %131 = arith.andi %129, %130 : i1
    %132 = arith.extui %131 : i1 to i32
    %133 = arith.sitofp %132 : i32 to f32
    %134 = vector.broadcast %133 : f32 to vector<18x1xf32>
    %135 = arith.mulf %11, %134 : vector<18x1xf32>
    %136 = vector.broadcast %135 : vector<18x1xf32> to vector<18x128xf32>
    %137 = arith.mulf %128, %136 : vector<18x128xf32>
    %138 = arith.truncf %137 : vector<18x128xf32> to vector<18x128xbf16>
    %c4 = arith.constant 4 : index
    %c0_68 = arith.constant 0 : index
    %c0_69 = arith.constant 0 : index
    %139 = vector.load %arg14[%c4, %c0_68, %c0_69] : memref<6x18x128xbf16, #tpu.memory_space<vmem>>, vector<1x18x128xbf16>
    %140 = vector.shape_cast %139 : vector<1x18x128xbf16> to vector<18x128xbf16>
    %141 = vector.shape_cast %138 : vector<18x128xbf16> to vector<1x18x128xbf16>
    tpu.vector_store %arg14[%c4, %c0_68, %c0_69], %141 {strides = array<i32>} : memref<6x18x128xbf16, #tpu.memory_space<vmem>>, vector<1x18x128xbf16>,
    %c5_i32 = arith.constant 5 : i32
    %142 = arith.addi %1, %c5_i32 : i32
    %c0_70 = arith.constant 0 : index
    %143 = arith.index_cast %142 : i32 to index
    %c0_71 = arith.constant 0 : index
    %c0_72 = arith.constant 0 : index
    %144 = vector.load %arg2[%c0_70, %143, %c0_71, %c0_72] : memref<1x18x18x32xbf16, #tpu.memory_space<vmem>>, vector<1x1x18x32xbf16>
    %145 = vector.shape_cast %144 : vector<1x1x18x32xbf16> to vector<18x32xbf16>
    %cst_73 = arith.constant dense<0.000000e+00> : vector<18x128xf32>
    %146 = tpu.matmul %145, %8, %cst_73 {dimension_numbers = #tpu.dot_dimension_numbers<[1], [0], [0], [1], [0, 0, 1, 1], [], []>} : vector<18x32xbf16>, vector<32x128xbf16>, vector<18x128xf32> -> vector<18x128xf32>
    %147 = vector.broadcast %9 : vector<1x128xf32> to vector<18x128xf32>
    %148 = arith.mulf %146, %147 : vector<18x128xf32>
    %149 = vector.broadcast %10 : vector<1x128xf32> to vector<18x128xf32>
    %150 = arith.addf %148, %149 : vector<18x128xf32>
    %cst_74 = arith.constant 0.000000e+00 : f32
    %cst_75 = arith.constant 6.000000e+00 : f32
    %151 = vector.broadcast %cst_74 : f32 to vector<18x128xf32>
    %152 = arith.maximumf %151, %150 : vector<18x128xf32>
    %153 = vector.broadcast %cst_75 : f32 to vector<18x128xf32>
    %154 = arith.minimumf %153, %152 : vector<18x128xf32>
    %c1_i32_76 = arith.constant 1 : i32
    %155 = arith.cmpi sge, %142, %c1_i32_76 : i32
    %c16_i32_77 = arith.constant 16 : i32
    %156 = arith.cmpi sle, %142, %c16_i32_77 : i32
    %157 = arith.andi %155, %156 : i1
    %158 = arith.extui %157 : i1 to i32
    %159 = arith.sitofp %158 : i32 to f32
    %160 = vector.broadcast %159 : f32 to vector<18x1xf32>
    %161 = arith.mulf %11, %160 : vector<18x1xf32>
    %162 = vector.broadcast %161 : vector<18x1xf32> to vector<18x128xf32>
    %163 = arith.mulf %154, %162 : vector<18x128xf32>
    %164 = arith.truncf %163 : vector<18x128xf32> to vector<18x128xbf16>
    %c5 = arith.constant 5 : index
    %c0_78 = arith.constant 0 : index
    %c0_79 = arith.constant 0 : index
    %165 = vector.load %arg14[%c5, %c0_78, %c0_79] : memref<6x18x128xbf16, #tpu.memory_space<vmem>>, vector<1x18x128xbf16>
    %166 = vector.shape_cast %165 : vector<1x18x128xbf16> to vector<18x128xbf16>
    %167 = vector.shape_cast %164 : vector<18x128xbf16> to vector<1x18x128xbf16>
    tpu.vector_store %arg14[%c5, %c0_78, %c0_79], %167 {strides = array<i32>} : memref<6x18x128xbf16, #tpu.memory_space<vmem>>, vector<1x18x128xbf16>,
    %cst_80 = arith.constant 0.000000e+00 : f32
    %168 = vector.broadcast %cst_80 : f32 to vector<16x128xf32>
    %c0_81 = arith.constant 0 : index
    %c0_82 = arith.constant 0 : index
    %c0_83 = arith.constant 0 : index
    %169 = vector.load %arg14[%c0_81, %c0_82, %c0_83] : memref<6x18x128xbf16, #tpu.memory_space<vmem>>, vector<1x16x128xbf16>
    %170 = vector.shape_cast %169 : vector<1x16x128xbf16> to vector<16x128xbf16>
    %171 = arith.extf %170 : vector<16x128xbf16> to vector<16x128xf32>
    %172 = vector.extract_strided_slice %2 {offsets = [0, 0, 0], sizes = [1, 1, 128], strides = [1, 1, 1]} : vector<3x3x128xf32> to vector<1x1x128xf32>
    %173 = vector.shape_cast %172 : vector<1x1x128xf32> to vector<128xf32>
    %174 = vector.shape_cast %173 : vector<128xf32> to vector<1x128xf32>
    %175 = vector.broadcast %174 : vector<1x128xf32> to vector<16x128xf32>
    %176 = arith.mulf %171, %175 : vector<16x128xf32>
    %177 = arith.addf %168, %176 : vector<16x128xf32>
    %c0_84 = arith.constant 0 : index
    %c1_85 = arith.constant 1 : index
    %c0_86 = arith.constant 0 : index
    %178 = vector.load %arg14[%c0_84, %c1_85, %c0_86] : memref<6x18x128xbf16, #tpu.memory_space<vmem>>, vector<1x16x128xbf16>
    %179 = vector.shape_cast %178 : vector<1x16x128xbf16> to vector<16x128xbf16>
    %180 = arith.extf %179 : vector<16x128xbf16> to vector<16x128xf32>
    %181 = vector.extract_strided_slice %2 {offsets = [0, 1, 0], sizes = [1, 1, 128], strides = [1, 1, 1]} : vector<3x3x128xf32> to vector<1x1x128xf32>
    %182 = vector.shape_cast %181 : vector<1x1x128xf32> to vector<128xf32>
    %183 = vector.shape_cast %182 : vector<128xf32> to vector<1x128xf32>
    %184 = vector.broadcast %183 : vector<1x128xf32> to vector<16x128xf32>
    %185 = arith.mulf %180, %184 : vector<16x128xf32>
    %186 = arith.addf %177, %185 : vector<16x128xf32>
    %c0_87 = arith.constant 0 : index
    %c2_88 = arith.constant 2 : index
    %c0_89 = arith.constant 0 : index
    %187 = vector.load %arg14[%c0_87, %c2_88, %c0_89] : memref<6x18x128xbf16, #tpu.memory_space<vmem>>, vector<1x16x128xbf16>
    %188 = vector.shape_cast %187 : vector<1x16x128xbf16> to vector<16x128xbf16>
    %189 = arith.extf %188 : vector<16x128xbf16> to vector<16x128xf32>
    %190 = vector.extract_strided_slice %2 {offsets = [0, 2, 0], sizes = [1, 1, 128], strides = [1, 1, 1]} : vector<3x3x128xf32> to vector<1x1x128xf32>
    %191 = vector.shape_cast %190 : vector<1x1x128xf32> to vector<128xf32>
    %192 = vector.shape_cast %191 : vector<128xf32> to vector<1x128xf32>
    %193 = vector.broadcast %192 : vector<1x128xf32> to vector<16x128xf32>
    %194 = arith.mulf %189, %193 : vector<16x128xf32>
    %195 = arith.addf %186, %194 : vector<16x128xf32>
    %c1_90 = arith.constant 1 : index
    %c0_91 = arith.constant 0 : index
    %c0_92 = arith.constant 0 : index
    %196 = vector.load %arg14[%c1_90, %c0_91, %c0_92] : memref<6x18x128xbf16, #tpu.memory_space<vmem>>, vector<1x16x128xbf16>
    %197 = vector.shape_cast %196 : vector<1x16x128xbf16> to vector<16x128xbf16>
    %198 = arith.extf %197 : vector<16x128xbf16> to vector<16x128xf32>
    %199 = vector.extract_strided_slice %2 {offsets = [1, 0, 0], sizes = [1, 1, 128], strides = [1, 1, 1]} : vector<3x3x128xf32> to vector<1x1x128xf32>
    %200 = vector.shape_cast %199 : vector<1x1x128xf32> to vector<128xf32>
    %201 = vector.shape_cast %200 : vector<128xf32> to vector<1x128xf32>
    %202 = vector.broadcast %201 : vector<1x128xf32> to vector<16x128xf32>
    %203 = arith.mulf %198, %202 : vector<16x128xf32>
    %204 = arith.addf %195, %203 : vector<16x128xf32>
    %c1_93 = arith.constant 1 : index
    %c1_94 = arith.constant 1 : index
    %c0_95 = arith.constant 0 : index
    %205 = vector.load %arg14[%c1_93, %c1_94, %c0_95] : memref<6x18x128xbf16, #tpu.memory_space<vmem>>, vector<1x16x128xbf16>
    %206 = vector.shape_cast %205 : vector<1x16x128xbf16> to vector<16x128xbf16>
    %207 = arith.extf %206 : vector<16x128xbf16> to vector<16x128xf32>
    %208 = vector.extract_strided_slice %2 {offsets = [1, 1, 0], sizes = [1, 1, 128], strides = [1, 1, 1]} : vector<3x3x128xf32> to vector<1x1x128xf32>
    %209 = vector.shape_cast %208 : vector<1x1x128xf32> to vector<128xf32>
    %210 = vector.shape_cast %209 : vector<128xf32> to vector<1x128xf32>
    %211 = vector.broadcast %210 : vector<1x128xf32> to vector<16x128xf32>
    %212 = arith.mulf %207, %211 : vector<16x128xf32>
    %213 = arith.addf %204, %212 : vector<16x128xf32>
    %c1_96 = arith.constant 1 : index
    %c2_97 = arith.constant 2 : index
    %c0_98 = arith.constant 0 : index
    %214 = vector.load %arg14[%c1_96, %c2_97, %c0_98] : memref<6x18x128xbf16, #tpu.memory_space<vmem>>, vector<1x16x128xbf16>
    %215 = vector.shape_cast %214 : vector<1x16x128xbf16> to vector<16x128xbf16>
    %216 = arith.extf %215 : vector<16x128xbf16> to vector<16x128xf32>
    %217 = vector.extract_strided_slice %2 {offsets = [1, 2, 0], sizes = [1, 1, 128], strides = [1, 1, 1]} : vector<3x3x128xf32> to vector<1x1x128xf32>
    %218 = vector.shape_cast %217 : vector<1x1x128xf32> to vector<128xf32>
    %219 = vector.shape_cast %218 : vector<128xf32> to vector<1x128xf32>
    %220 = vector.broadcast %219 : vector<1x128xf32> to vector<16x128xf32>
    %221 = arith.mulf %216, %220 : vector<16x128xf32>
    %222 = arith.addf %213, %221 : vector<16x128xf32>
    %c2_99 = arith.constant 2 : index
    %c0_100 = arith.constant 0 : index
    %c0_101 = arith.constant 0 : index
    %223 = vector.load %arg14[%c2_99, %c0_100, %c0_101] : memref<6x18x128xbf16, #tpu.memory_space<vmem>>, vector<1x16x128xbf16>
    %224 = vector.shape_cast %223 : vector<1x16x128xbf16> to vector<16x128xbf16>
    %225 = arith.extf %224 : vector<16x128xbf16> to vector<16x128xf32>
    %226 = vector.extract_strided_slice %2 {offsets = [2, 0, 0], sizes = [1, 1, 128], strides = [1, 1, 1]} : vector<3x3x128xf32> to vector<1x1x128xf32>
    %227 = vector.shape_cast %226 : vector<1x1x128xf32> to vector<128xf32>
    %228 = vector.shape_cast %227 : vector<128xf32> to vector<1x128xf32>
    %229 = vector.broadcast %228 : vector<1x128xf32> to vector<16x128xf32>
    %230 = arith.mulf %225, %229 : vector<16x128xf32>
    %231 = arith.addf %222, %230 : vector<16x128xf32>
    %c2_102 = arith.constant 2 : index
    %c1_103 = arith.constant 1 : index
    %c0_104 = arith.constant 0 : index
    %232 = vector.load %arg14[%c2_102, %c1_103, %c0_104] : memref<6x18x128xbf16, #tpu.memory_space<vmem>>, vector<1x16x128xbf16>
    %233 = vector.shape_cast %232 : vector<1x16x128xbf16> to vector<16x128xbf16>
    %234 = arith.extf %233 : vector<16x128xbf16> to vector<16x128xf32>
    %235 = vector.extract_strided_slice %2 {offsets = [2, 1, 0], sizes = [1, 1, 128], strides = [1, 1, 1]} : vector<3x3x128xf32> to vector<1x1x128xf32>
    %236 = vector.shape_cast %235 : vector<1x1x128xf32> to vector<128xf32>
    %237 = vector.shape_cast %236 : vector<128xf32> to vector<1x128xf32>
    %238 = vector.broadcast %237 : vector<1x128xf32> to vector<16x128xf32>
    %239 = arith.mulf %234, %238 : vector<16x128xf32>
    %240 = arith.addf %231, %239 : vector<16x128xf32>
    %c2_105 = arith.constant 2 : index
    %c2_106 = arith.constant 2 : index
    %c0_107 = arith.constant 0 : index
    %241 = vector.load %arg14[%c2_105, %c2_106, %c0_107] : memref<6x18x128xbf16, #tpu.memory_space<vmem>>, vector<1x16x128xbf16>
    %242 = vector.shape_cast %241 : vector<1x16x128xbf16> to vector<16x128xbf16>
    %243 = arith.extf %242 : vector<16x128xbf16> to vector<16x128xf32>
    %244 = vector.extract_strided_slice %2 {offsets = [2, 2, 0], sizes = [1, 1, 128], strides = [1, 1, 1]} : vector<3x3x128xf32> to vector<1x1x128xf32>
    %245 = vector.shape_cast %244 : vector<1x1x128xf32> to vector<128xf32>
    %246 = vector.shape_cast %245 : vector<128xf32> to vector<1x128xf32>
    %247 = vector.broadcast %246 : vector<1x128xf32> to vector<16x128xf32>
    %248 = arith.mulf %243, %247 : vector<16x128xf32>
    %249 = arith.addf %240, %248 : vector<16x128xf32>
    %250 = vector.broadcast %3 : vector<1x128xf32> to vector<16x128xf32>
    %251 = arith.mulf %249, %250 : vector<16x128xf32>
    %252 = vector.broadcast %4 : vector<1x128xf32> to vector<16x128xf32>
    %253 = arith.addf %251, %252 : vector<16x128xf32>
    %cst_108 = arith.constant 0.000000e+00 : f32
    %cst_109 = arith.constant 6.000000e+00 : f32
    %254 = vector.broadcast %cst_108 : f32 to vector<16x128xf32>
    %255 = arith.maximumf %254, %253 : vector<16x128xf32>
    %256 = vector.broadcast %cst_109 : f32 to vector<16x128xf32>
    %257 = arith.minimumf %256, %255 : vector<16x128xf32>
    %258 = arith.truncf %257 : vector<16x128xf32> to vector<16x128xbf16>
    %cst_110 = arith.constant dense<0.000000e+00> : vector<16x32xf32>
    %259 = tpu.matmul %258, %5, %cst_110 {dimension_numbers = #tpu.dot_dimension_numbers<[1], [0], [0], [1], [0, 0, 1, 1], [], []>} : vector<16x128xbf16>, vector<128x32xbf16>, vector<16x32xf32> -> vector<16x32xf32>
    %260 = vector.broadcast %6 : vector<1x32xf32> to vector<16x32xf32>
    %261 = arith.mulf %259, %260 : vector<16x32xf32>
    %262 = vector.broadcast %7 : vector<1x32xf32> to vector<16x32xf32>
    %263 = arith.addf %261, %262 : vector<16x32xf32>
    %c1_i32_111 = arith.constant 1 : i32
    %264 = arith.addi %1, %c1_i32_111 : i32
    %c0_i32_112 = arith.constant 0 : i32
    %265 = arith.addi %264, %c0_i32_112 : i32
    %c0_113 = arith.constant 0 : index
    %266 = arith.index_cast %265 : i32 to index
    %c1_114 = arith.constant 1 : index
    %c0_115 = arith.constant 0 : index
    %267 = vector.load %arg2[%c0_113, %266, %c1_114, %c0_115] : memref<1x18x18x32xbf16, #tpu.memory_space<vmem>>, vector<1x1x16x32xbf16>
    %268 = vector.shape_cast %267 : vector<1x1x16x32xbf16> to vector<16x32xbf16>
    %269 = arith.extf %268 : vector<16x32xbf16> to vector<16x32xf32>
    %270 = arith.addf %263, %269 : vector<16x32xf32>
    %cst_116 = arith.constant 0.000000e+00 : f32
    %cst_117 = arith.constant 6.000000e+00 : f32
    %271 = vector.broadcast %cst_116 : f32 to vector<16x32xf32>
    %272 = arith.maximumf %271, %270 : vector<16x32xf32>
    %273 = vector.broadcast %cst_117 : f32 to vector<16x32xf32>
    %274 = arith.minimumf %273, %272 : vector<16x32xf32>
    %275 = arith.truncf %274 : vector<16x32xf32> to vector<16x32xbf16>
    %c0_118 = arith.constant 0 : index
    %c0_119 = arith.constant 0 : index
    %c0_120 = arith.constant 0 : index
    %c0_121 = arith.constant 0 : index
    %276 = vector.load %arg13[%c0_118, %c0_119, %c0_120, %c0_121] : memref<1x4x16x32xbf16, #tpu.memory_space<vmem>>, vector<1x1x16x32xbf16>
    %277 = vector.shape_cast %276 : vector<1x1x16x32xbf16> to vector<16x32xbf16>
    %278 = vector.shape_cast %275 : vector<16x32xbf16> to vector<1x1x16x32xbf16>
    tpu.vector_store %arg13[%c0_118, %c0_119, %c0_120, %c0_121], %278 {strides = array<i32>} : memref<1x4x16x32xbf16, #tpu.memory_space<vmem>>, vector<1x1x16x32xbf16>,
    %cst_122 = arith.constant 0.000000e+00 : f32
    %279 = vector.broadcast %cst_122 : f32 to vector<16x128xf32>
    %c1_123 = arith.constant 1 : index
    %c0_124 = arith.constant 0 : index
    %c0_125 = arith.constant 0 : index
    %280 = vector.load %arg14[%c1_123, %c0_124, %c0_125] : memref<6x18x128xbf16, #tpu.memory_space<vmem>>, vector<1x16x128xbf16>
    %281 = vector.shape_cast %280 : vector<1x16x128xbf16> to vector<16x128xbf16>
    %282 = arith.extf %281 : vector<16x128xbf16> to vector<16x128xf32>
    %283 = vector.extract_strided_slice %2 {offsets = [0, 0, 0], sizes = [1, 1, 128], strides = [1, 1, 1]} : vector<3x3x128xf32> to vector<1x1x128xf32>
    %284 = vector.shape_cast %283 : vector<1x1x128xf32> to vector<128xf32>
    %285 = vector.shape_cast %284 : vector<128xf32> to vector<1x128xf32>
    %286 = vector.broadcast %285 : vector<1x128xf32> to vector<16x128xf32>
    %287 = arith.mulf %282, %286 : vector<16x128xf32>
    %288 = arith.addf %279, %287 : vector<16x128xf32>
    %c1_126 = arith.constant 1 : index
    %c1_127 = arith.constant 1 : index
    %c0_128 = arith.constant 0 : index
    %289 = vector.load %arg14[%c1_126, %c1_127, %c0_128] : memref<6x18x128xbf16, #tpu.memory_space<vmem>>, vector<1x16x128xbf16>
    %290 = vector.shape_cast %289 : vector<1x16x128xbf16> to vector<16x128xbf16>
    %291 = arith.extf %290 : vector<16x128xbf16> to vector<16x128xf32>
    %292 = vector.extract_strided_slice %2 {offsets = [0, 1, 0], sizes = [1, 1, 128], strides = [1, 1, 1]} : vector<3x3x128xf32> to vector<1x1x128xf32>
    %293 = vector.shape_cast %292 : vector<1x1x128xf32> to vector<128xf32>
    %294 = vector.shape_cast %293 : vector<128xf32> to vector<1x128xf32>
    %295 = vector.broadcast %294 : vector<1x128xf32> to vector<16x128xf32>
    %296 = arith.mulf %291, %295 : vector<16x128xf32>
    %297 = arith.addf %288, %296 : vector<16x128xf32>
    %c1_129 = arith.constant 1 : index
    %c2_130 = arith.constant 2 : index
    %c0_131 = arith.constant 0 : index
    %298 = vector.load %arg14[%c1_129, %c2_130, %c0_131] : memref<6x18x128xbf16, #tpu.memory_space<vmem>>, vector<1x16x128xbf16>
    %299 = vector.shape_cast %298 : vector<1x16x128xbf16> to vector<16x128xbf16>
    %300 = arith.extf %299 : vector<16x128xbf16> to vector<16x128xf32>
    %301 = vector.extract_strided_slice %2 {offsets = [0, 2, 0], sizes = [1, 1, 128], strides = [1, 1, 1]} : vector<3x3x128xf32> to vector<1x1x128xf32>
    %302 = vector.shape_cast %301 : vector<1x1x128xf32> to vector<128xf32>
    %303 = vector.shape_cast %302 : vector<128xf32> to vector<1x128xf32>
    %304 = vector.broadcast %303 : vector<1x128xf32> to vector<16x128xf32>
    %305 = arith.mulf %300, %304 : vector<16x128xf32>
    %306 = arith.addf %297, %305 : vector<16x128xf32>
    %c2_132 = arith.constant 2 : index
    %c0_133 = arith.constant 0 : index
    %c0_134 = arith.constant 0 : index
    %307 = vector.load %arg14[%c2_132, %c0_133, %c0_134] : memref<6x18x128xbf16, #tpu.memory_space<vmem>>, vector<1x16x128xbf16>
    %308 = vector.shape_cast %307 : vector<1x16x128xbf16> to vector<16x128xbf16>
    %309 = arith.extf %308 : vector<16x128xbf16> to vector<16x128xf32>
    %310 = vector.extract_strided_slice %2 {offsets = [1, 0, 0], sizes = [1, 1, 128], strides = [1, 1, 1]} : vector<3x3x128xf32> to vector<1x1x128xf32>
    %311 = vector.shape_cast %310 : vector<1x1x128xf32> to vector<128xf32>
    %312 = vector.shape_cast %311 : vector<128xf32> to vector<1x128xf32>
    %313 = vector.broadcast %312 : vector<1x128xf32> to vector<16x128xf32>
    %314 = arith.mulf %309, %313 : vector<16x128xf32>
    %315 = arith.addf %306, %314 : vector<16x128xf32>
    %c2_135 = arith.constant 2 : index
    %c1_136 = arith.constant 1 : index
    %c0_137 = arith.constant 0 : index
    %316 = vector.load %arg14[%c2_135, %c1_136, %c0_137] : memref<6x18x128xbf16, #tpu.memory_space<vmem>>, vector<1x16x128xbf16>
    %317 = vector.shape_cast %316 : vector<1x16x128xbf16> to vector<16x128xbf16>
    %318 = arith.extf %317 : vector<16x128xbf16> to vector<16x128xf32>
    %319 = vector.extract_strided_slice %2 {offsets = [1, 1, 0], sizes = [1, 1, 128], strides = [1, 1, 1]} : vector<3x3x128xf32> to vector<1x1x128xf32>
    %320 = vector.shape_cast %319 : vector<1x1x128xf32> to vector<128xf32>
    %321 = vector.shape_cast %320 : vector<128xf32> to vector<1x128xf32>
    %322 = vector.broadcast %321 : vector<1x128xf32> to vector<16x128xf32>
    %323 = arith.mulf %318, %322 : vector<16x128xf32>
    %324 = arith.addf %315, %323 : vector<16x128xf32>
    %c2_138 = arith.constant 2 : index
    %c2_139 = arith.constant 2 : index
    %c0_140 = arith.constant 0 : index
    %325 = vector.load %arg14[%c2_138, %c2_139, %c0_140] : memref<6x18x128xbf16, #tpu.memory_space<vmem>>, vector<1x16x128xbf16>
    %326 = vector.shape_cast %325 : vector<1x16x128xbf16> to vector<16x128xbf16>
    %327 = arith.extf %326 : vector<16x128xbf16> to vector<16x128xf32>
    %328 = vector.extract_strided_slice %2 {offsets = [1, 2, 0], sizes = [1, 1, 128], strides = [1, 1, 1]} : vector<3x3x128xf32> to vector<1x1x128xf32>
    %329 = vector.shape_cast %328 : vector<1x1x128xf32> to vector<128xf32>
    %330 = vector.shape_cast %329 : vector<128xf32> to vector<1x128xf32>
    %331 = vector.broadcast %330 : vector<1x128xf32> to vector<16x128xf32>
    %332 = arith.mulf %327, %331 : vector<16x128xf32>
    %333 = arith.addf %324, %332 : vector<16x128xf32>
    %c3_141 = arith.constant 3 : index
    %c0_142 = arith.constant 0 : index
    %c0_143 = arith.constant 0 : index
    %334 = vector.load %arg14[%c3_141, %c0_142, %c0_143] : memref<6x18x128xbf16, #tpu.memory_space<vmem>>, vector<1x16x128xbf16>
    %335 = vector.shape_cast %334 : vector<1x16x128xbf16> to vector<16x128xbf16>
    %336 = arith.extf %335 : vector<16x128xbf16> to vector<16x128xf32>
    %337 = vector.extract_strided_slice %2 {offsets = [2, 0, 0], sizes = [1, 1, 128], strides = [1, 1, 1]} : vector<3x3x128xf32> to vector<1x1x128xf32>
    %338 = vector.shape_cast %337 : vector<1x1x128xf32> to vector<128xf32>
    %339 = vector.shape_cast %338 : vector<128xf32> to vector<1x128xf32>
    %340 = vector.broadcast %339 : vector<1x128xf32> to vector<16x128xf32>
    %341 = arith.mulf %336, %340 : vector<16x128xf32>
    %342 = arith.addf %333, %341 : vector<16x128xf32>
    %c3_144 = arith.constant 3 : index
    %c1_145 = arith.constant 1 : index
    %c0_146 = arith.constant 0 : index
    %343 = vector.load %arg14[%c3_144, %c1_145, %c0_146] : memref<6x18x128xbf16, #tpu.memory_space<vmem>>, vector<1x16x128xbf16>
    %344 = vector.shape_cast %343 : vector<1x16x128xbf16> to vector<16x128xbf16>
    %345 = arith.extf %344 : vector<16x128xbf16> to vector<16x128xf32>
    %346 = vector.extract_strided_slice %2 {offsets = [2, 1, 0], sizes = [1, 1, 128], strides = [1, 1, 1]} : vector<3x3x128xf32> to vector<1x1x128xf32>
    %347 = vector.shape_cast %346 : vector<1x1x128xf32> to vector<128xf32>
    %348 = vector.shape_cast %347 : vector<128xf32> to vector<1x128xf32>
    %349 = vector.broadcast %348 : vector<1x128xf32> to vector<16x128xf32>
    %350 = arith.mulf %345, %349 : vector<16x128xf32>
    %351 = arith.addf %342, %350 : vector<16x128xf32>
    %c3_147 = arith.constant 3 : index
    %c2_148 = arith.constant 2 : index
    %c0_149 = arith.constant 0 : index
    %352 = vector.load %arg14[%c3_147, %c2_148, %c0_149] : memref<6x18x128xbf16, #tpu.memory_space<vmem>>, vector<1x16x128xbf16>
    %353 = vector.shape_cast %352 : vector<1x16x128xbf16> to vector<16x128xbf16>
    %354 = arith.extf %353 : vector<16x128xbf16> to vector<16x128xf32>
    %355 = vector.extract_strided_slice %2 {offsets = [2, 2, 0], sizes = [1, 1, 128], strides = [1, 1, 1]} : vector<3x3x128xf32> to vector<1x1x128xf32>
    %356 = vector.shape_cast %355 : vector<1x1x128xf32> to vector<128xf32>
    %357 = vector.shape_cast %356 : vector<128xf32> to vector<1x128xf32>
    %358 = vector.broadcast %357 : vector<1x128xf32> to vector<16x128xf32>
    %359 = arith.mulf %354, %358 : vector<16x128xf32>
    %360 = arith.addf %351, %359 : vector<16x128xf32>
    %361 = vector.broadcast %3 : vector<1x128xf32> to vector<16x128xf32>
    %362 = arith.mulf %360, %361 : vector<16x128xf32>
    %363 = vector.broadcast %4 : vector<1x128xf32> to vector<16x128xf32>
    %364 = arith.addf %362, %363 : vector<16x128xf32>
    %cst_150 = arith.constant 0.000000e+00 : f32
    %cst_151 = arith.constant 6.000000e+00 : f32
    %365 = vector.broadcast %cst_150 : f32 to vector<16x128xf32>
    %366 = arith.maximumf %365, %364 : vector<16x128xf32>
    %367 = vector.broadcast %cst_151 : f32 to vector<16x128xf32>
    %368 = arith.minimumf %367, %366 : vector<16x128xf32>
    %369 = arith.truncf %368 : vector<16x128xf32> to vector<16x128xbf16>
    %cst_152 = arith.constant dense<0.000000e+00> : vector<16x32xf32>
    %370 = tpu.matmul %369, %5, %cst_152 {dimension_numbers = #tpu.dot_dimension_numbers<[1], [0], [0], [1], [0, 0, 1, 1], [], []>} : vector<16x128xbf16>, vector<128x32xbf16>, vector<16x32xf32> -> vector<16x32xf32>
    %371 = vector.broadcast %6 : vector<1x32xf32> to vector<16x32xf32>
    %372 = arith.mulf %370, %371 : vector<16x32xf32>
    %373 = vector.broadcast %7 : vector<1x32xf32> to vector<16x32xf32>
    %374 = arith.addf %372, %373 : vector<16x32xf32>
    %c1_i32_153 = arith.constant 1 : i32
    %375 = arith.addi %1, %c1_i32_153 : i32
    %c1_i32_154 = arith.constant 1 : i32
    %376 = arith.addi %375, %c1_i32_154 : i32
    %c0_155 = arith.constant 0 : index
    %377 = arith.index_cast %376 : i32 to index
    %c1_156 = arith.constant 1 : index
    %c0_157 = arith.constant 0 : index
    %378 = vector.load %arg2[%c0_155, %377, %c1_156, %c0_157] : memref<1x18x18x32xbf16, #tpu.memory_space<vmem>>, vector<1x1x16x32xbf16>
    %379 = vector.shape_cast %378 : vector<1x1x16x32xbf16> to vector<16x32xbf16>
    %380 = arith.extf %379 : vector<16x32xbf16> to vector<16x32xf32>
    %381 = arith.addf %374, %380 : vector<16x32xf32>
    %cst_158 = arith.constant 0.000000e+00 : f32
    %cst_159 = arith.constant 6.000000e+00 : f32
    %382 = vector.broadcast %cst_158 : f32 to vector<16x32xf32>
    %383 = arith.maximumf %382, %381 : vector<16x32xf32>
    %384 = vector.broadcast %cst_159 : f32 to vector<16x32xf32>
    %385 = arith.minimumf %384, %383 : vector<16x32xf32>
    %386 = arith.truncf %385 : vector<16x32xf32> to vector<16x32xbf16>
    %c0_160 = arith.constant 0 : index
    %c1_161 = arith.constant 1 : index
    %c0_162 = arith.constant 0 : index
    %c0_163 = arith.constant 0 : index
    %387 = vector.load %arg13[%c0_160, %c1_161, %c0_162, %c0_163] : memref<1x4x16x32xbf16, #tpu.memory_space<vmem>>, vector<1x1x16x32xbf16>
    %388 = vector.shape_cast %387 : vector<1x1x16x32xbf16> to vector<16x32xbf16>
    %389 = vector.shape_cast %386 : vector<16x32xbf16> to vector<1x1x16x32xbf16>
    tpu.vector_store %arg13[%c0_160, %c1_161, %c0_162, %c0_163], %389 {strides = array<i32>} : memref<1x4x16x32xbf16, #tpu.memory_space<vmem>>, vector<1x1x16x32xbf16>,
    %cst_164 = arith.constant 0.000000e+00 : f32
    %390 = vector.broadcast %cst_164 : f32 to vector<16x128xf32>
    %c2_165 = arith.constant 2 : index
    %c0_166 = arith.constant 0 : index
    %c0_167 = arith.constant 0 : index
    %391 = vector.load %arg14[%c2_165, %c0_166, %c0_167] : memref<6x18x128xbf16, #tpu.memory_space<vmem>>, vector<1x16x128xbf16>
    %392 = vector.shape_cast %391 : vector<1x16x128xbf16> to vector<16x128xbf16>
    %393 = arith.extf %392 : vector<16x128xbf16> to vector<16x128xf32>
    %394 = vector.extract_strided_slice %2 {offsets = [0, 0, 0], sizes = [1, 1, 128], strides = [1, 1, 1]} : vector<3x3x128xf32> to vector<1x1x128xf32>
    %395 = vector.shape_cast %394 : vector<1x1x128xf32> to vector<128xf32>
    %396 = vector.shape_cast %395 : vector<128xf32> to vector<1x128xf32>
    %397 = vector.broadcast %396 : vector<1x128xf32> to vector<16x128xf32>
    %398 = arith.mulf %393, %397 : vector<16x128xf32>
    %399 = arith.addf %390, %398 : vector<16x128xf32>
    %c2_168 = arith.constant 2 : index
    %c1_169 = arith.constant 1 : index
    %c0_170 = arith.constant 0 : index
    %400 = vector.load %arg14[%c2_168, %c1_169, %c0_170] : memref<6x18x128xbf16, #tpu.memory_space<vmem>>, vector<1x16x128xbf16>
    %401 = vector.shape_cast %400 : vector<1x16x128xbf16> to vector<16x128xbf16>
    %402 = arith.extf %401 : vector<16x128xbf16> to vector<16x128xf32>
    %403 = vector.extract_strided_slice %2 {offsets = [0, 1, 0], sizes = [1, 1, 128], strides = [1, 1, 1]} : vector<3x3x128xf32> to vector<1x1x128xf32>
    %404 = vector.shape_cast %403 : vector<1x1x128xf32> to vector<128xf32>
    %405 = vector.shape_cast %404 : vector<128xf32> to vector<1x128xf32>
    %406 = vector.broadcast %405 : vector<1x128xf32> to vector<16x128xf32>
    %407 = arith.mulf %402, %406 : vector<16x128xf32>
    %408 = arith.addf %399, %407 : vector<16x128xf32>
    %c2_171 = arith.constant 2 : index
    %c2_172 = arith.constant 2 : index
    %c0_173 = arith.constant 0 : index
    %409 = vector.load %arg14[%c2_171, %c2_172, %c0_173] : memref<6x18x128xbf16, #tpu.memory_space<vmem>>, vector<1x16x128xbf16>
    %410 = vector.shape_cast %409 : vector<1x16x128xbf16> to vector<16x128xbf16>
    %411 = arith.extf %410 : vector<16x128xbf16> to vector<16x128xf32>
    %412 = vector.extract_strided_slice %2 {offsets = [0, 2, 0], sizes = [1, 1, 128], strides = [1, 1, 1]} : vector<3x3x128xf32> to vector<1x1x128xf32>
    %413 = vector.shape_cast %412 : vector<1x1x128xf32> to vector<128xf32>
    %414 = vector.shape_cast %413 : vector<128xf32> to vector<1x128xf32>
    %415 = vector.broadcast %414 : vector<1x128xf32> to vector<16x128xf32>
    %416 = arith.mulf %411, %415 : vector<16x128xf32>
    %417 = arith.addf %408, %416 : vector<16x128xf32>
    %c3_174 = arith.constant 3 : index
    %c0_175 = arith.constant 0 : index
    %c0_176 = arith.constant 0 : index
    %418 = vector.load %arg14[%c3_174, %c0_175, %c0_176] : memref<6x18x128xbf16, #tpu.memory_space<vmem>>, vector<1x16x128xbf16>
    %419 = vector.shape_cast %418 : vector<1x16x128xbf16> to vector<16x128xbf16>
    %420 = arith.extf %419 : vector<16x128xbf16> to vector<16x128xf32>
    %421 = vector.extract_strided_slice %2 {offsets = [1, 0, 0], sizes = [1, 1, 128], strides = [1, 1, 1]} : vector<3x3x128xf32> to vector<1x1x128xf32>
    %422 = vector.shape_cast %421 : vector<1x1x128xf32> to vector<128xf32>
    %423 = vector.shape_cast %422 : vector<128xf32> to vector<1x128xf32>
    %424 = vector.broadcast %423 : vector<1x128xf32> to vector<16x128xf32>
    %425 = arith.mulf %420, %424 : vector<16x128xf32>
    %426 = arith.addf %417, %425 : vector<16x128xf32>
    %c3_177 = arith.constant 3 : index
    %c1_178 = arith.constant 1 : index
    %c0_179 = arith.constant 0 : index
    %427 = vector.load %arg14[%c3_177, %c1_178, %c0_179] : memref<6x18x128xbf16, #tpu.memory_space<vmem>>, vector<1x16x128xbf16>
    %428 = vector.shape_cast %427 : vector<1x16x128xbf16> to vector<16x128xbf16>
    %429 = arith.extf %428 : vector<16x128xbf16> to vector<16x128xf32>
    %430 = vector.extract_strided_slice %2 {offsets = [1, 1, 0], sizes = [1, 1, 128], strides = [1, 1, 1]} : vector<3x3x128xf32> to vector<1x1x128xf32>
    %431 = vector.shape_cast %430 : vector<1x1x128xf32> to vector<128xf32>
    %432 = vector.shape_cast %431 : vector<128xf32> to vector<1x128xf32>
    %433 = vector.broadcast %432 : vector<1x128xf32> to vector<16x128xf32>
    %434 = arith.mulf %429, %433 : vector<16x128xf32>
    %435 = arith.addf %426, %434 : vector<16x128xf32>
    %c3_180 = arith.constant 3 : index
    %c2_181 = arith.constant 2 : index
    %c0_182 = arith.constant 0 : index
    %436 = vector.load %arg14[%c3_180, %c2_181, %c0_182] : memref<6x18x128xbf16, #tpu.memory_space<vmem>>, vector<1x16x128xbf16>
    %437 = vector.shape_cast %436 : vector<1x16x128xbf16> to vector<16x128xbf16>
    %438 = arith.extf %437 : vector<16x128xbf16> to vector<16x128xf32>
    %439 = vector.extract_strided_slice %2 {offsets = [1, 2, 0], sizes = [1, 1, 128], strides = [1, 1, 1]} : vector<3x3x128xf32> to vector<1x1x128xf32>
    %440 = vector.shape_cast %439 : vector<1x1x128xf32> to vector<128xf32>
    %441 = vector.shape_cast %440 : vector<128xf32> to vector<1x128xf32>
    %442 = vector.broadcast %441 : vector<1x128xf32> to vector<16x128xf32>
    %443 = arith.mulf %438, %442 : vector<16x128xf32>
    %444 = arith.addf %435, %443 : vector<16x128xf32>
    %c4_183 = arith.constant 4 : index
    %c0_184 = arith.constant 0 : index
    %c0_185 = arith.constant 0 : index
    %445 = vector.load %arg14[%c4_183, %c0_184, %c0_185] : memref<6x18x128xbf16, #tpu.memory_space<vmem>>, vector<1x16x128xbf16>
    %446 = vector.shape_cast %445 : vector<1x16x128xbf16> to vector<16x128xbf16>
    %447 = arith.extf %446 : vector<16x128xbf16> to vector<16x128xf32>
    %448 = vector.extract_strided_slice %2 {offsets = [2, 0, 0], sizes = [1, 1, 128], strides = [1, 1, 1]} : vector<3x3x128xf32> to vector<1x1x128xf32>
    %449 = vector.shape_cast %448 : vector<1x1x128xf32> to vector<128xf32>
    %450 = vector.shape_cast %449 : vector<128xf32> to vector<1x128xf32>
    %451 = vector.broadcast %450 : vector<1x128xf32> to vector<16x128xf32>
    %452 = arith.mulf %447, %451 : vector<16x128xf32>
    %453 = arith.addf %444, %452 : vector<16x128xf32>
    %c4_186 = arith.constant 4 : index
    %c1_187 = arith.constant 1 : index
    %c0_188 = arith.constant 0 : index
    %454 = vector.load %arg14[%c4_186, %c1_187, %c0_188] : memref<6x18x128xbf16, #tpu.memory_space<vmem>>, vector<1x16x128xbf16>
    %455 = vector.shape_cast %454 : vector<1x16x128xbf16> to vector<16x128xbf16>
    %456 = arith.extf %455 : vector<16x128xbf16> to vector<16x128xf32>
    %457 = vector.extract_strided_slice %2 {offsets = [2, 1, 0], sizes = [1, 1, 128], strides = [1, 1, 1]} : vector<3x3x128xf32> to vector<1x1x128xf32>
    %458 = vector.shape_cast %457 : vector<1x1x128xf32> to vector<128xf32>
    %459 = vector.shape_cast %458 : vector<128xf32> to vector<1x128xf32>
    %460 = vector.broadcast %459 : vector<1x128xf32> to vector<16x128xf32>
    %461 = arith.mulf %456, %460 : vector<16x128xf32>
    %462 = arith.addf %453, %461 : vector<16x128xf32>
    %c4_189 = arith.constant 4 : index
    %c2_190 = arith.constant 2 : index
    %c0_191 = arith.constant 0 : index
    %463 = vector.load %arg14[%c4_189, %c2_190, %c0_191] : memref<6x18x128xbf16, #tpu.memory_space<vmem>>, vector<1x16x128xbf16>
    %464 = vector.shape_cast %463 : vector<1x16x128xbf16> to vector<16x128xbf16>
    %465 = arith.extf %464 : vector<16x128xbf16> to vector<16x128xf32>
    %466 = vector.extract_strided_slice %2 {offsets = [2, 2, 0], sizes = [1, 1, 128], strides = [1, 1, 1]} : vector<3x3x128xf32> to vector<1x1x128xf32>
    %467 = vector.shape_cast %466 : vector<1x1x128xf32> to vector<128xf32>
    %468 = vector.shape_cast %467 : vector<128xf32> to vector<1x128xf32>
    %469 = vector.broadcast %468 : vector<1x128xf32> to vector<16x128xf32>
    %470 = arith.mulf %465, %469 : vector<16x128xf32>
    %471 = arith.addf %462, %470 : vector<16x128xf32>
    %472 = vector.broadcast %3 : vector<1x128xf32> to vector<16x128xf32>
    %473 = arith.mulf %471, %472 : vector<16x128xf32>
    %474 = vector.broadcast %4 : vector<1x128xf32> to vector<16x128xf32>
    %475 = arith.addf %473, %474 : vector<16x128xf32>
    %cst_192 = arith.constant 0.000000e+00 : f32
    %cst_193 = arith.constant 6.000000e+00 : f32
    %476 = vector.broadcast %cst_192 : f32 to vector<16x128xf32>
    %477 = arith.maximumf %476, %475 : vector<16x128xf32>
    %478 = vector.broadcast %cst_193 : f32 to vector<16x128xf32>
    %479 = arith.minimumf %478, %477 : vector<16x128xf32>
    %480 = arith.truncf %479 : vector<16x128xf32> to vector<16x128xbf16>
    %cst_194 = arith.constant dense<0.000000e+00> : vector<16x32xf32>
    %481 = tpu.matmul %480, %5, %cst_194 {dimension_numbers = #tpu.dot_dimension_numbers<[1], [0], [0], [1], [0, 0, 1, 1], [], []>} : vector<16x128xbf16>, vector<128x32xbf16>, vector<16x32xf32> -> vector<16x32xf32>
    %482 = vector.broadcast %6 : vector<1x32xf32> to vector<16x32xf32>
    %483 = arith.mulf %481, %482 : vector<16x32xf32>
    %484 = vector.broadcast %7 : vector<1x32xf32> to vector<16x32xf32>
    %485 = arith.addf %483, %484 : vector<16x32xf32>
    %c1_i32_195 = arith.constant 1 : i32
    %486 = arith.addi %1, %c1_i32_195 : i32
    %c2_i32_196 = arith.constant 2 : i32
    %487 = arith.addi %486, %c2_i32_196 : i32
    %c0_197 = arith.constant 0 : index
    %488 = arith.index_cast %487 : i32 to index
    %c1_198 = arith.constant 1 : index
    %c0_199 = arith.constant 0 : index
    %489 = vector.load %arg2[%c0_197, %488, %c1_198, %c0_199] : memref<1x18x18x32xbf16, #tpu.memory_space<vmem>>, vector<1x1x16x32xbf16>
    %490 = vector.shape_cast %489 : vector<1x1x16x32xbf16> to vector<16x32xbf16>
    %491 = arith.extf %490 : vector<16x32xbf16> to vector<16x32xf32>
    %492 = arith.addf %485, %491 : vector<16x32xf32>
    %cst_200 = arith.constant 0.000000e+00 : f32
    %cst_201 = arith.constant 6.000000e+00 : f32
    %493 = vector.broadcast %cst_200 : f32 to vector<16x32xf32>
    %494 = arith.maximumf %493, %492 : vector<16x32xf32>
    %495 = vector.broadcast %cst_201 : f32 to vector<16x32xf32>
    %496 = arith.minimumf %495, %494 : vector<16x32xf32>
    %497 = arith.truncf %496 : vector<16x32xf32> to vector<16x32xbf16>
    %c0_202 = arith.constant 0 : index
    %c2_203 = arith.constant 2 : index
    %c0_204 = arith.constant 0 : index
    %c0_205 = arith.constant 0 : index
    %498 = vector.load %arg13[%c0_202, %c2_203, %c0_204, %c0_205] : memref<1x4x16x32xbf16, #tpu.memory_space<vmem>>, vector<1x1x16x32xbf16>
    %499 = vector.shape_cast %498 : vector<1x1x16x32xbf16> to vector<16x32xbf16>
    %500 = vector.shape_cast %497 : vector<16x32xbf16> to vector<1x1x16x32xbf16>
    tpu.vector_store %arg13[%c0_202, %c2_203, %c0_204, %c0_205], %500 {strides = array<i32>} : memref<1x4x16x32xbf16, #tpu.memory_space<vmem>>, vector<1x1x16x32xbf16>,
    %cst_206 = arith.constant 0.000000e+00 : f32
    %501 = vector.broadcast %cst_206 : f32 to vector<16x128xf32>
    %c3_207 = arith.constant 3 : index
    %c0_208 = arith.constant 0 : index
    %c0_209 = arith.constant 0 : index
    %502 = vector.load %arg14[%c3_207, %c0_208, %c0_209] : memref<6x18x128xbf16, #tpu.memory_space<vmem>>, vector<1x16x128xbf16>
    %503 = vector.shape_cast %502 : vector<1x16x128xbf16> to vector<16x128xbf16>
    %504 = arith.extf %503 : vector<16x128xbf16> to vector<16x128xf32>
    %505 = vector.extract_strided_slice %2 {offsets = [0, 0, 0], sizes = [1, 1, 128], strides = [1, 1, 1]} : vector<3x3x128xf32> to vector<1x1x128xf32>
    %506 = vector.shape_cast %505 : vector<1x1x128xf32> to vector<128xf32>
    %507 = vector.shape_cast %506 : vector<128xf32> to vector<1x128xf32>
    %508 = vector.broadcast %507 : vector<1x128xf32> to vector<16x128xf32>
    %509 = arith.mulf %504, %508 : vector<16x128xf32>
    %510 = arith.addf %501, %509 : vector<16x128xf32>
    %c3_210 = arith.constant 3 : index
    %c1_211 = arith.constant 1 : index
    %c0_212 = arith.constant 0 : index
    %511 = vector.load %arg14[%c3_210, %c1_211, %c0_212] : memref<6x18x128xbf16, #tpu.memory_space<vmem>>, vector<1x16x128xbf16>
    %512 = vector.shape_cast %511 : vector<1x16x128xbf16> to vector<16x128xbf16>
    %513 = arith.extf %512 : vector<16x128xbf16> to vector<16x128xf32>
    %514 = vector.extract_strided_slice %2 {offsets = [0, 1, 0], sizes = [1, 1, 128], strides = [1, 1, 1]} : vector<3x3x128xf32> to vector<1x1x128xf32>
    %515 = vector.shape_cast %514 : vector<1x1x128xf32> to vector<128xf32>
    %516 = vector.shape_cast %515 : vector<128xf32> to vector<1x128xf32>
    %517 = vector.broadcast %516 : vector<1x128xf32> to vector<16x128xf32>
    %518 = arith.mulf %513, %517 : vector<16x128xf32>
    %519 = arith.addf %510, %518 : vector<16x128xf32>
    %c3_213 = arith.constant 3 : index
    %c2_214 = arith.constant 2 : index
    %c0_215 = arith.constant 0 : index
    %520 = vector.load %arg14[%c3_213, %c2_214, %c0_215] : memref<6x18x128xbf16, #tpu.memory_space<vmem>>, vector<1x16x128xbf16>
    %521 = vector.shape_cast %520 : vector<1x16x128xbf16> to vector<16x128xbf16>
    %522 = arith.extf %521 : vector<16x128xbf16> to vector<16x128xf32>
    %523 = vector.extract_strided_slice %2 {offsets = [0, 2, 0], sizes = [1, 1, 128], strides = [1, 1, 1]} : vector<3x3x128xf32> to vector<1x1x128xf32>
    %524 = vector.shape_cast %523 : vector<1x1x128xf32> to vector<128xf32>
    %525 = vector.shape_cast %524 : vector<128xf32> to vector<1x128xf32>
    %526 = vector.broadcast %525 : vector<1x128xf32> to vector<16x128xf32>
    %527 = arith.mulf %522, %526 : vector<16x128xf32>
    %528 = arith.addf %519, %527 : vector<16x128xf32>
    %c4_216 = arith.constant 4 : index
    %c0_217 = arith.constant 0 : index
    %c0_218 = arith.constant 0 : index
    %529 = vector.load %arg14[%c4_216, %c0_217, %c0_218] : memref<6x18x128xbf16, #tpu.memory_space<vmem>>, vector<1x16x128xbf16>
    %530 = vector.shape_cast %529 : vector<1x16x128xbf16> to vector<16x128xbf16>
    %531 = arith.extf %530 : vector<16x128xbf16> to vector<16x128xf32>
    %532 = vector.extract_strided_slice %2 {offsets = [1, 0, 0], sizes = [1, 1, 128], strides = [1, 1, 1]} : vector<3x3x128xf32> to vector<1x1x128xf32>
    %533 = vector.shape_cast %532 : vector<1x1x128xf32> to vector<128xf32>
    %534 = vector.shape_cast %533 : vector<128xf32> to vector<1x128xf32>
    %535 = vector.broadcast %534 : vector<1x128xf32> to vector<16x128xf32>
    %536 = arith.mulf %531, %535 : vector<16x128xf32>
    %537 = arith.addf %528, %536 : vector<16x128xf32>
    %c4_219 = arith.constant 4 : index
    %c1_220 = arith.constant 1 : index
    %c0_221 = arith.constant 0 : index
    %538 = vector.load %arg14[%c4_219, %c1_220, %c0_221] : memref<6x18x128xbf16, #tpu.memory_space<vmem>>, vector<1x16x128xbf16>
    %539 = vector.shape_cast %538 : vector<1x16x128xbf16> to vector<16x128xbf16>
    %540 = arith.extf %539 : vector<16x128xbf16> to vector<16x128xf32>
    %541 = vector.extract_strided_slice %2 {offsets = [1, 1, 0], sizes = [1, 1, 128], strides = [1, 1, 1]} : vector<3x3x128xf32> to vector<1x1x128xf32>
    %542 = vector.shape_cast %541 : vector<1x1x128xf32> to vector<128xf32>
    %543 = vector.shape_cast %542 : vector<128xf32> to vector<1x128xf32>
    %544 = vector.broadcast %543 : vector<1x128xf32> to vector<16x128xf32>
    %545 = arith.mulf %540, %544 : vector<16x128xf32>
    %546 = arith.addf %537, %545 : vector<16x128xf32>
    %c4_222 = arith.constant 4 : index
    %c2_223 = arith.constant 2 : index
    %c0_224 = arith.constant 0 : index
    %547 = vector.load %arg14[%c4_222, %c2_223, %c0_224] : memref<6x18x128xbf16, #tpu.memory_space<vmem>>, vector<1x16x128xbf16>
    %548 = vector.shape_cast %547 : vector<1x16x128xbf16> to vector<16x128xbf16>
    %549 = arith.extf %548 : vector<16x128xbf16> to vector<16x128xf32>
    %550 = vector.extract_strided_slice %2 {offsets = [1, 2, 0], sizes = [1, 1, 128], strides = [1, 1, 1]} : vector<3x3x128xf32> to vector<1x1x128xf32>
    %551 = vector.shape_cast %550 : vector<1x1x128xf32> to vector<128xf32>
    %552 = vector.shape_cast %551 : vector<128xf32> to vector<1x128xf32>
    %553 = vector.broadcast %552 : vector<1x128xf32> to vector<16x128xf32>
    %554 = arith.mulf %549, %553 : vector<16x128xf32>
    %555 = arith.addf %546, %554 : vector<16x128xf32>
    %c5_225 = arith.constant 5 : index
    %c0_226 = arith.constant 0 : index
    %c0_227 = arith.constant 0 : index
    %556 = vector.load %arg14[%c5_225, %c0_226, %c0_227] : memref<6x18x128xbf16, #tpu.memory_space<vmem>>, vector<1x16x128xbf16>
    %557 = vector.shape_cast %556 : vector<1x16x128xbf16> to vector<16x128xbf16>
    %558 = arith.extf %557 : vector<16x128xbf16> to vector<16x128xf32>
    %559 = vector.extract_strided_slice %2 {offsets = [2, 0, 0], sizes = [1, 1, 128], strides = [1, 1, 1]} : vector<3x3x128xf32> to vector<1x1x128xf32>
    %560 = vector.shape_cast %559 : vector<1x1x128xf32> to vector<128xf32>
    %561 = vector.shape_cast %560 : vector<128xf32> to vector<1x128xf32>
    %562 = vector.broadcast %561 : vector<1x128xf32> to vector<16x128xf32>
    %563 = arith.mulf %558, %562 : vector<16x128xf32>
    %564 = arith.addf %555, %563 : vector<16x128xf32>
    %c5_228 = arith.constant 5 : index
    %c1_229 = arith.constant 1 : index
    %c0_230 = arith.constant 0 : index
    %565 = vector.load %arg14[%c5_228, %c1_229, %c0_230] : memref<6x18x128xbf16, #tpu.memory_space<vmem>>, vector<1x16x128xbf16>
    %566 = vector.shape_cast %565 : vector<1x16x128xbf16> to vector<16x128xbf16>
    %567 = arith.extf %566 : vector<16x128xbf16> to vector<16x128xf32>
    %568 = vector.extract_strided_slice %2 {offsets = [2, 1, 0], sizes = [1, 1, 128], strides = [1, 1, 1]} : vector<3x3x128xf32> to vector<1x1x128xf32>
    %569 = vector.shape_cast %568 : vector<1x1x128xf32> to vector<128xf32>
    %570 = vector.shape_cast %569 : vector<128xf32> to vector<1x128xf32>
    %571 = vector.broadcast %570 : vector<1x128xf32> to vector<16x128xf32>
    %572 = arith.mulf %567, %571 : vector<16x128xf32>
    %573 = arith.addf %564, %572 : vector<16x128xf32>
    %c5_231 = arith.constant 5 : index
    %c2_232 = arith.constant 2 : index
    %c0_233 = arith.constant 0 : index
    %574 = vector.load %arg14[%c5_231, %c2_232, %c0_233] : memref<6x18x128xbf16, #tpu.memory_space<vmem>>, vector<1x16x128xbf16>
    %575 = vector.shape_cast %574 : vector<1x16x128xbf16> to vector<16x128xbf16>
    %576 = arith.extf %575 : vector<16x128xbf16> to vector<16x128xf32>
    %577 = vector.extract_strided_slice %2 {offsets = [2, 2, 0], sizes = [1, 1, 128], strides = [1, 1, 1]} : vector<3x3x128xf32> to vector<1x1x128xf32>
    %578 = vector.shape_cast %577 : vector<1x1x128xf32> to vector<128xf32>
    %579 = vector.shape_cast %578 : vector<128xf32> to vector<1x128xf32>
    %580 = vector.broadcast %579 : vector<1x128xf32> to vector<16x128xf32>
    %581 = arith.mulf %576, %580 : vector<16x128xf32>
    %582 = arith.addf %573, %581 : vector<16x128xf32>
    %583 = vector.broadcast %3 : vector<1x128xf32> to vector<16x128xf32>
    %584 = arith.mulf %582, %583 : vector<16x128xf32>
    %585 = vector.broadcast %4 : vector<1x128xf32> to vector<16x128xf32>
    %586 = arith.addf %584, %585 : vector<16x128xf32>
    %cst_234 = arith.constant 0.000000e+00 : f32
    %cst_235 = arith.constant 6.000000e+00 : f32
    %587 = vector.broadcast %cst_234 : f32 to vector<16x128xf32>
    %588 = arith.maximumf %587, %586 : vector<16x128xf32>
    %589 = vector.broadcast %cst_235 : f32 to vector<16x128xf32>
    %590 = arith.minimumf %589, %588 : vector<16x128xf32>
    %591 = arith.truncf %590 : vector<16x128xf32> to vector<16x128xbf16>
    %cst_236 = arith.constant dense<0.000000e+00> : vector<16x32xf32>
    %592 = tpu.matmul %591, %5, %cst_236 {dimension_numbers = #tpu.dot_dimension_numbers<[1], [0], [0], [1], [0, 0, 1, 1], [], []>} : vector<16x128xbf16>, vector<128x32xbf16>, vector<16x32xf32> -> vector<16x32xf32>
    %593 = vector.broadcast %6 : vector<1x32xf32> to vector<16x32xf32>
    %594 = arith.mulf %592, %593 : vector<16x32xf32>
    %595 = vector.broadcast %7 : vector<1x32xf32> to vector<16x32xf32>
    %596 = arith.addf %594, %595 : vector<16x32xf32>
    %c1_i32_237 = arith.constant 1 : i32
    %597 = arith.addi %1, %c1_i32_237 : i32
    %c3_i32_238 = arith.constant 3 : i32
    %598 = arith.addi %597, %c3_i32_238 : i32
    %c0_239 = arith.constant 0 : index
    %599 = arith.index_cast %598 : i32 to index
    %c1_240 = arith.constant 1 : index
    %c0_241 = arith.constant 0 : index
    %600 = vector.load %arg2[%c0_239, %599, %c1_240, %c0_241] : memref<1x18x18x32xbf16, #tpu.memory_space<vmem>>, vector<1x1x16x32xbf16>
    %601 = vector.shape_cast %600 : vector<1x1x16x32xbf16> to vector<16x32xbf16>
    %602 = arith.extf %601 : vector<16x32xbf16> to vector<16x32xf32>
    %603 = arith.addf %596, %602 : vector<16x32xf32>
    %cst_242 = arith.constant 0.000000e+00 : f32
    %cst_243 = arith.constant 6.000000e+00 : f32
    %604 = vector.broadcast %cst_242 : f32 to vector<16x32xf32>
    %605 = arith.maximumf %604, %603 : vector<16x32xf32>
    %606 = vector.broadcast %cst_243 : f32 to vector<16x32xf32>
    %607 = arith.minimumf %606, %605 : vector<16x32xf32>
    %608 = arith.truncf %607 : vector<16x32xf32> to vector<16x32xbf16>
    %c0_244 = arith.constant 0 : index
    %c3_245 = arith.constant 3 : index
    %c0_246 = arith.constant 0 : index
    %c0_247 = arith.constant 0 : index
    %609 = vector.load %arg13[%c0_244, %c3_245, %c0_246, %c0_247] : memref<1x4x16x32xbf16, #tpu.memory_space<vmem>>, vector<1x1x16x32xbf16>
    %610 = vector.shape_cast %609 : vector<1x1x16x32xbf16> to vector<16x32xbf16>
    %611 = vector.shape_cast %608 : vector<16x32xbf16> to vector<1x1x16x32xbf16>
    tpu.vector_store %arg13[%c0_244, %c3_245, %c0_246, %c0_247], %611 {strides = array<i32>} : memref<1x4x16x32xbf16, #tpu.memory_space<vmem>>, vector<1x1x16x32xbf16>,
    return
  }
  func.func @transform_0(%arg0: i32, %arg1: i32) -> (i32, i32, i32, i32) {
    %c0_i32 = arith.constant 0 : i32
    %c0_i32_0 = arith.constant 0 : i32
    %c0_i32_1 = arith.constant 0 : i32
    %c0_i32_2 = arith.constant 0 : i32
    return %arg0, %c0_i32, %c0_i32_0, %c0_i32_1 : i32, i32, i32, i32
  }
  func.func @transform_1(%arg0: i32, %arg1: i32) -> (i32, i32) {
    %c0_i32 = arith.constant 0 : i32
    %c0_i32_0 = arith.constant 0 : i32
    %c0_i32_1 = arith.constant 0 : i32
    return %c0_i32, %c0_i32_0 : i32, i32
  }
  func.func @transform_2(%arg0: i32, %arg1: i32) -> (i32, i32) {
    %c0_i32 = arith.constant 0 : i32
    %c0_i32_0 = arith.constant 0 : i32
    %c0_i32_1 = arith.constant 0 : i32
    return %c0_i32, %c0_i32_0 : i32, i32
  }
  func.func @transform_3(%arg0: i32, %arg1: i32) -> (i32, i32) {
    %c0_i32 = arith.constant 0 : i32
    %c0_i32_0 = arith.constant 0 : i32
    %c0_i32_1 = arith.constant 0 : i32
    return %c0_i32, %c0_i32_0 : i32, i32
  }
  func.func @transform_4(%arg0: i32, %arg1: i32) -> (i32, i32) {
    %c0_i32 = arith.constant 0 : i32
    %c0_i32_0 = arith.constant 0 : i32
    %c0_i32_1 = arith.constant 0 : i32
    return %c0_i32, %c0_i32_0 : i32, i32
  }
  func.func @transform_5(%arg0: i32, %arg1: i32) -> (i32, i32, i32) {
    %c0_i32 = arith.constant 0 : i32
    %c0_i32_0 = arith.constant 0 : i32
    %c0_i32_1 = arith.constant 0 : i32
    %c0_i32_2 = arith.constant 0 : i32
    return %c0_i32, %c0_i32_0, %c0_i32_1 : i32, i32, i32
  }
  func.func @transform_6(%arg0: i32, %arg1: i32) -> (i32, i32) {
    %c0_i32 = arith.constant 0 : i32
    %c0_i32_0 = arith.constant 0 : i32
    %c0_i32_1 = arith.constant 0 : i32
    return %c0_i32, %c0_i32_0 : i32, i32
  }
  func.func @transform_7(%arg0: i32, %arg1: i32) -> (i32, i32) {
    %c0_i32 = arith.constant 0 : i32
    %c0_i32_0 = arith.constant 0 : i32
    %c0_i32_1 = arith.constant 0 : i32
    return %c0_i32, %c0_i32_0 : i32, i32
  }
  func.func @transform_8(%arg0: i32, %arg1: i32) -> (i32, i32) {
    %c0_i32 = arith.constant 0 : i32
    %c0_i32_0 = arith.constant 0 : i32
    %c0_i32_1 = arith.constant 0 : i32
    return %c0_i32, %c0_i32_0 : i32, i32
  }
  func.func @transform_9(%arg0: i32, %arg1: i32) -> (i32, i32) {
    %c0_i32 = arith.constant 0 : i32
    %c0_i32_0 = arith.constant 0 : i32
    %c0_i32_1 = arith.constant 0 : i32
    return %c0_i32, %c0_i32_0 : i32, i32
  }
  func.func @transform_10(%arg0: i32, %arg1: i32) -> (i32, i32) {
    %c0_i32 = arith.constant 0 : i32
    %c0_i32_0 = arith.constant 0 : i32
    %c0_i32_1 = arith.constant 0 : i32
    return %c0_i32, %c0_i32_0 : i32, i32
  }
  func.func @transform_11(%arg0: i32, %arg1: i32) -> (i32, i32, i32, i32) {
    %c0_i32 = arith.constant 0 : i32
    %c0_i32_0 = arith.constant 0 : i32
    %c0_i32_1 = arith.constant 0 : i32
    return %arg0, %arg1, %c0_i32, %c0_i32_0 : i32, i32, i32, i32
  }
}

</mosaic_0001>

<bundles_post_ra>
// kernel: inverted_residual.1
= control target key start
LH: loop header
LB: loop body
LE: loop exit
PB: predicated region body
PF: predicated region fallthrough
CT: control target
= control target key end

     0   :  { %s3796_s0 = inlined_call_operand.vmem [shape: bf16[2,18,18,32], index: 0, kind: input, shape index: {}]   ;;  %s3797_s1 = inlined_call_operand.vmem [shape: f32[18,1], index: 1, kind: input, shape index: {}]   ;;  %s3798_s2 = inlined_call_operand.vmem [shape: bf16[32,128], index: 2, kind: input, shape index: {}]   ;;  %s3799_s3 = inlined_call_operand.vmem [shape: f32[1,128], index: 3, kind: input, shape index: {}]   ;;  %s3800_s4 = inlined_call_operand.vmem [shape: f32[1,128], index: 4, kind: input, shape index: {}]   ;;  %s3801_s5 = inlined_call_operand.vmem [shape: f32[3,3,128], index: 5, kind: input, shape index: {}]   ;;  %s3802_s6 = inlined_call_operand.vmem [shape: f32[1,128], index: 6, kind: input, shape index: {}]   ;;  %s3803_s7 = inlined_call_operand.vmem [shape: f32[1,128], index: 7, kind: input, shape index: {}]   ;;  %s3804_s8 = inlined_call_operand.vmem [shape: bf16[128,32], index: 8, kind: input, shape index: {}]   ;;  %s3805_s9 = inlined_call_operand.vmem [shape: f32[1,32], index: 9, kind: input, shape index: {}]   ;;  %s3806_s10 = inlined_call_operand.vmem [shape: f32[1,32], index: 10, kind: input, shape index: {}]   ;;  %s3807_s11 = inlined_call_operand.hbm [shape: bf16[2,16,16,32], index: 11, kind: output, shape index: {}]  }
   0x1   :  { %3814 = sst [smem:[#allocation13_spill]] %s3796_s0 }
   0x2   :  { %3815 = sst [smem:[#allocation14_spill]] %s3798_s2 }
   0x3   :  { %16 = vsyncpa [#allocation4], 0 }
   0x4   :  { %18 = vsyncpa [#allocation4 + $0x1], 0  ;;  %s2956_s17 = smov 0   ;;  %s2958_s18 = smov 0  }
   0x5   :  { %s2960_s19 = smov 0   ;;  %s2962_s20 = smov 0  }
   0x6   :  { %s2964_s21 = smov 0   ;;  %s2966_s22 = smov 0  }
   0x7   :  { %s2968_s23 = smov 0   ;;  %s2970_s24 = smov 0  }
   0x8 LB: > { %3816 = sst [smem:[#allocation6_spill]] %s2868_s19  ;;  %s2290_s25 = sadd.s32 4294967295, %s2888_s24   ;;  %s2888_s24 = sphi %s2970_s24, %s24_s24   ;;  %s2884_s23 = sphi %s2968_s23, %s3844_s23   ;;  %s2880_s22 = sphi %s2966_s22, %s3843_s22   ;;  %s2876_s21 = sphi %s2964_s21, %s3842_s21   ;;  %s2872_s20 = sphi %s2962_s20, %s3841_s20   ;;  %s2868_s19 = sphi %s2960_s19, %s3847_s19   ;;  %s2864_s18 = sphi %s2958_s18, %s3846_s18   ;;  %s2860_s17 = sphi %s2956_s17, %s3845_s17  }
   0x9   : > { %3817 = sst [smem:[#allocation7_spill]] %s2880_s22  ;;  %s2291_s26 = sadd.s32 4294967294, %s2888_s24  }
   0xa   : > { %3818 = sst [smem:[#allocation8_spill]] %s2884_s23  ;;  %s33_s27 = sadd.s32 1, %s2880_s22 }
   0xb   : > { %p34_p0 = scmp.ge.s32.totalorder %s33_s27, 4  ;;  %s36_s28 = sadd.s32 1, %s2884_s23 }
   0xc   : > { %p291_p1 = scmp.ne.s32.totalorder %s2868_s19, %s2864_s18  ;;  %p292_p2 = scmp.eq.s32.totalorder %s2290_s25, 7 }
   0xd   : > { %s3849_s27 = smov (%p34_p0, %s33_s27), 0  ;;  %s3851_s28 = smov (!%p34_p0, %s36_s28), %s2884_s23 }
   0xe   : > { %3819 = sst [smem:[#allocation9_spill]] %s3849_s27  ;;  %s277_s29 = ssub.s32 %s2880_s22, %s3849_s27 }
   0xf   : > { %p3007_p3 = por %p292_p2, %p291_p1  ;;  %p38_p4 = scmp.ge.s32.totalorder %s3851_s28, 2 }
  0x10   : > { %p297_p5 = scmp.ne.s32.totalorder %s2864_s18, %s2860_s17  ;;  %p298_p6 = scmp.eq.s32.totalorder %s2291_s26, 7 }
  0x11   : > { %p2294_p7 = scmp.ge.s32.totalorder %s2888_s24, 1  ;;  %s3853_s28 = smov (%p38_p4, %s3851_s28), 0 }
  0x12   : > { %3821 = sst [smem:[#allocation10_spill]] %s3853_s28  ;;  %p3016_p8 = por %p298_p6, %p297_p5 }
  0x13   : > { %p354_p9 = scmp.lt.s32.totalorder %s2888_s24, 9  ;;  %s276_s13 = ssub.s32 %s2884_s23, %s3853_s28 }
  0x14   : > { %s3822_s12 = scalar_select %p3016_p8, 1, 0 }
  0x15   : > { %s281_s14 = sadd.s32 1, %s2868_s19  ;;  %s278_s15 = sor.u32 %s277_s29, %s276_s13 }
  0x16   : > { %3823 = sst [smem:[#allocation11_spill]] %s3822_s12  ;;  %p355_p10 = pnand %p2294_p7, %p354_p9 }
  0x17   : > { %p279_p11 = scmp.eq.s32.totalorder %s278_s15, 0  ;;  %s3825_s2 = sld [smem:[#allocation14_spill]] (!%p355_p10)  ;;  %v2890_v2 = vmov (!%p355_p10), 0   ;;  %vm460_vm0 = vcmask (!%p355_p10), 261120   ;;  %v3136_v13 = vld [vmem:[%s3797_s1] sm:$0xff] (!%p355_p10)  ;;  %v432_v16 = vld [vmem:[%s3797_s1 + $0x8] sm:$0xff] (!%p355_p10)  ;;  %v1217_v58 = vlaneseq (!%p355_p10) }
  0x18   : > { %358 = sbr.rel (%p355_p10) target bundleno = 621 (0x26d), region = 64  ;;  %p394_p12 = scmp.lt.s32.totalorder (!%p355_p10), %s2876_s21, 1  ;;  %2764 = vset.pattern.permute.xlu0 (!%p355_p10), %v2890_v2  ;;  %2765 = vset.pattern.permute.xlu1 (!%p355_p10), %v2890_v2  ;;  %v3141_v14 = vld [vmem:[%s3797_s1 + $0x10] sm:$0x3] (!%p355_p10)  ;;  %v3211_v42 = vld [vmem:[%s3804_s8] sm:$0xff] (!%p355_p10)   ;;  %v2891_v43 = vmov (!%p355_p10), 0.0  }
  0x19   : > { %s3025_s16 = scalar_select %p279_p11, %s2868_s19, %s281_s14  }
  0x1a   : > { %s2422_s27 = smul.u32 (!%p355_p10), 48, %s2872_s20  ;;  %s3045_s13 = sshll.u32 (!%p355_p10), %s2872_s20, 2  ;;  %v3222_v44 = vld [vmem:[%s3804_s8 + $0x8] sm:$0xff] (!%p355_p10)   ;;  %v3231_v45 = vld [vmem:[%s3804_s8 + $0x10] sm:$0xff] (!%p355_p10)   ;;  %v3239_v46 = vld [vmem:[%s3804_s8 + $0x18] sm:$0xff] (!%p355_p10)   ;;  %vm2892_vm1 = vmmov (!%p355_p10), 0  }
  0x1b   : > { %3824 = sst [smem:[#allocation12_spill]] %s3025_s16  ;;  %p539_p13 = scmp.ge.s32.totalorder (!%p355_p10), %s3045_s13, 1  ;;  %v3251_v47 = vld [vmem:[%s3804_s8 + $0x20] sm:$0xff] (!%p355_p10)   ;;  %v3260_v48 = vld [vmem:[%s3804_s8 + $0x28] sm:$0xff] (!%p355_p10)   ;;  %v3269_v49 = vld [vmem:[%s3804_s8 + $0x30] sm:$0xff] (!%p355_p10)   ;;  %v1218_v61 = vshrl.u32 (!%p355_p10), %v1217_v58, 7 }
  0x1c   : > { %p540_p0 = scmp.le.s32.totalorder (!%p355_p10), %s3045_s13, 16  ;;  %s583_s14 = sadd.s32 (!%p355_p10), 1, %s3045_s13  ;;  %v3278_v50 = vld [vmem:[%s3804_s8 + $0x38] sm:$0xff] (!%p355_p10)   ;;  %v3305_v62 = vld [vmem:[%s3799_s3] ss:$0 sm:$0xff] (!%p355_p10)  ;;  %vm1237_vm2 = vcmask (!%p355_p10), 1046528  }
  0x1d   : > { %v3030_v0 = vld [vmem:[%s3825_s2] sm:$0xff] (!%p355_p10)   ;;  %v3036_v1 = vld [vmem:[%s3825_s2 + $0x8] sm:$0xff] (!%p355_p10)   ;;  %s3826_s0 = sld [smem:[#allocation13_spill]] (!%p355_p10)  ;;  %p3055_p1 = scmp.ge.s32.totalorder (!%p355_p10), %s583_s14, 1  ;;  %v1219_v63 = vsub.s32 (!%p355_p10), 0, %v1218_v61  ;;  %vm1259_vm3 = vcmask (!%p355_p10), 1045504  }
  0x1e   : > { %2559 = vmatprep.subr.bf16.mxu0 (!%p355_p10), %v3030_v0  ;;  %2567 = vmatprep.subr.bf16.mxu1 (!%p355_p10), %v3030_v0  ;;  %p3066_p2 = scmp.le.s32.totalorder (!%p355_p10), %s583_s14, 16  ;;  %p3090_p4 = pnand (!%p355_p10), %p540_p0, %p539_p13  ;;  %v402_v2 = vld [vmem:[%s3801_s5] sm:$0x7] (!%p355_p10)  ;;  %vm1533_vm4 = vcmask (!%p355_p10), 257024  }
  0x1f   : > { %s395_s29 = scalar_select %p394_p12, %s2876_s21, 1  ;;  %2560 = vmatpush3.bf16.msra.mxu0 %v3030_v0  ;;  %2568 = vmatpush3.bf16.msra.mxu1 %v3030_v0 }
  0x20   : > { %2561 = vmatprep.subr.bf16.mxu0 %v3036_v1  ;;  %2569 = vmatprep.subr.bf16.mxu1 %v3036_v1  ;;  %p666_p6 = pnand %p3066_p2, %p3055_p1  ;;  %s961_s16 = sadd.s32 4, %s3045_s13 }
  0x21   : > { %s2687_s22 = smul.u32 216, %s395_s29  ;;  %p3170_p13 = scmp.ge.s32.totalorder %s961_s16, 1 }
  0x22   : > { %s2321_s28 = scalar_select %p666_p6, 0, 1 }
  0x23   : > { %s398_s26 = scalar_lea.vmem %s3826_s0, %s2687_s22  ;;  %2562 = vmatpush3.bf16.msra.mxu0 %v3036_v1  ;;  %2570 = vmatpush3.bf16.msra.mxu1 %v3036_v1  ;;  %p3175_p0 = scmp.le.s32.totalorder %s961_s16, 16 }
  0x24   : > { %s3061_s29 = scalar_lea.vmem %s398_s26, %s2422_s27  ;;  %2575 = vmatprep.subr.bf16.mxu0 %v3030_v0  ;;  %2583 = vmatprep.subr.bf16.mxu1 %v3030_v0  ;;  %s709_s27 = sadd.s32 2, %s3045_s13 }
  0x25   : > { %v2768_v3 = vld [vmem:[%s3061_s29] sm:$0xff]   ;;  %v2769_v4 = vld [vmem:[%s3061_s29 + $0xc] sm:$0xff]   ;;  %v2770_v5 = vld [vmem:[%s3061_s29 + $0x8] ss:$0 sps:$4 sm:$0x11]   ;;  %p3094_p5 = scmp.ge.s32.totalorder %s709_s27, 1  ;;  %s669_s23 = scvt.s32.f32 %s2321_s28 }
  0x26   : > { %2563 = vmatprep.mubr.msk.bf16.mxu0 %vm460_vm0, %v2768_v3  ;;  %v2772_v6 = vld [vmem:[%s3061_s29 + $0x18] sm:$0xff]   ;;  %2571 = vmatprep.mubr.msk.bf16.mxu1 %vm460_vm0, %v2769_v4  ;;  %v2771_v7 = vld [vmem:[%s3061_s29 + $0x14] ss:$0 sps:$4 sm:$0x11]   ;;  %v2773_v8 = vld [vmem:[%s3061_s29 + $0x24] sm:$0xff]   ;;  %p3103_p7 = scmp.le.s32.totalorder %s709_s27, 16  ;;  %p1044_p1 = pnand %p3175_p0, %p3170_p13 }
  0x27   : > { %2564 = vmatmul.mubr.msk.bf16.vlgmr.msra.gmra.mrb[0].mxu0 %vm460_vm0, %v2770_v5  ;;  %2572 = vmatmul.mubr.msk.bf16.vlgmr.msra.gmra.mrb[0].mxu1 %vm460_vm0, %v2771_v7  ;;  %v2774_v9 = vld [vmem:[%s3061_s29 + $0x20] ss:$0 sps:$4 sm:$0x11]   ;;  %v2775_v10 = vld [vmem:[%s3061_s29 + $0x2c] ss:$0 sps:$4 sm:$0x11]   ;;  %v670_v20 = vstv %s669_s23 }
  0x28   : > { %2576 = vmatpush3.bf16.msra.mxu0 %v3030_v0  ;;  %2584 = vmatpush3.bf16.msra.mxu1 %v3030_v0  ;;  %s835_s26 = sadd.s32 3, %s3045_s13  ;;  %v2776_v11 = vld [vmem:[%s3061_s29 + $0x30] sm:$0xff]   ;;  %v2777_v12 = vld [vmem:[%s3061_s29 + $0x3c] sm:$0xff]   ;;  %p792_p9 = pnand %p3103_p7, %p3094_p5  ;;  %v2778_v17 = vld [vmem:[%s3061_s29 + $0x38] ss:$0 sps:$4 sm:$0x11]   ;;  %v671_v23 = vmul.f32 %v670_v20, %v3136_v13  ;;  %v672_v24 = vmul.f32 %v670_v20, %v432_v16  ;;  %v673_v25 = vmul.f32 %v670_v20, %v3141_v14 }
  0x29   : > { %2577 = vmatprep.subr.bf16.mxu0 %v3036_v1  ;;  %2585 = vmatprep.subr.bf16.mxu1 %v3036_v1  ;;  %p3118_p10 = scmp.ge.s32.totalorder %s835_s26, 1  ;;  %p3143_p11 = scmp.le.s32.totalorder %s835_s26, 16  ;;  %v2779_v21 = vld [vmem:[%s3061_s29 + $0x44] ss:$0 sps:$4 sm:$0x11]   ;;  %v1251_v3 = vsub.s32 2, %v1218_v61 }
  0x2a   : > { %2579 = vmatprep.mubr.msk.bf16.mxu0 %vm460_vm0, %v2772_v6  ;;  %2587 = vmatprep.mubr.msk.bf16.mxu1 %vm460_vm0, %v2773_v8  ;;  %s2308_s0 = scalar_select %p3090_p4, 0, 1  ;;  %v3317_v5 = vld [vmem:[%s3800_s4] ss:$0 sm:$0xff] }
  0x2b   : > { %s2334_s12 = scalar_select %p792_p9, 0, 1 }
  0x2c   : > { %2578 = vmatpush3.bf16.msra.mxu0 %v3036_v1  ;;  %2586 = vmatpush3.bf16.msra.mxu1 %v3036_v1  ;;  %s544_s14 = scvt.s32.f32 %s2308_s0  ;;  %p918_p12 = pnand %p3143_p11, %p3118_p10 }
  0x2d   : > { %2591 = vmatprep.subr.bf16.mxu0 %v3030_v0  ;;  %2599 = vmatprep.subr.bf16.mxu1 %v3030_v0  ;;  %s795_s22 = scvt.s32.f32 %s2334_s12  ;;  %s1087_s26 = sadd.s32 5, %s3045_s13 }
  0x2e   : > { %v545_v15 = vstv %s544_s14  ;;  %s2347_s25 = scalar_select %p918_p12, 0, 1 }
  0x2f   : > { %2580 = vmatmul.mubr.msk.bf16.vlgmr.msra.gmra.mrb[4].mxu0 %vm460_vm0, %v2774_v9  ;;  %2588 = vmatmul.mubr.msk.bf16.vlgmr.msra.gmra.mrb[4].mxu1 %vm460_vm0, %v2775_v10  ;;  %v546_v18 = vmul.f32 %v545_v15, %v3136_v13  ;;  %v548_v19 = vmul.f32 %v545_v15, %v3141_v14  ;;  %v547_v22 = vmul.f32 %v545_v15, %v432_v16  ;;  %v796_v26 = vstv %s795_s22  ;;  %p3188_p2 = scmp.ge.s32.totalorder %s1087_s26, 1  ;;  %p3192_p4 = scmp.le.s32.totalorder %s1087_s26, 16  ;;  %v403_v10 = vld [vmem:[%s3801_s5 + $0x4] sm:$0x7] }
  0x30   : > { %2592 = vmatpush3.bf16.msra.mxu0 %v3030_v0  ;;  %2600 = vmatpush3.bf16.msra.mxu1 %v3030_v0  ;;  %s921_s27 = scvt.s32.f32 %s2347_s25  ;;  %v797_v27 = vmul.f32 %v796_v26, %v3136_v13  ;;  %v798_v28 = vmul.f32 %v796_v26, %v432_v16  ;;  %v799_v30 = vmul.f32 %v796_v26, %v3141_v14  ;;  %v1229_v0 = vsub.s32 1, %v1218_v61  ;;  %s391_s15 = sand.u32 1, %s2864_s18  }
  0x31   : > { %2593 = vmatprep.subr.bf16.mxu0 %v3036_v1  ;;  %2601 = vmatprep.subr.bf16.mxu1 %v3036_v1  ;;  %s2360_s13 = scalar_select %p1044_p1, 0, 1  ;;  %v3325_v15 = vrot.slane %v402_v2, %v1219_v63 }
  0x32   : > { %2595 = vmatprep.mubr.msk.bf16.mxu0 %vm460_vm0, %v2776_v11  ;;  %2603 = vmatprep.mubr.msk.bf16.mxu1 %vm460_vm0, %v2777_v12  ;;  %v922_v29 = vstv %s921_s27  ;;  %p1170_p5 = pnand %p3192_p4, %p3188_p2  ;;  %s2295_s25 = sshll.u32 %s391_s15, 5 }
  0x33   : > { %551 = vperm.xlu0 %2764, %v546_v18   ;;  %561 = vperm.xlu1 %2765, %v548_v19   ;;  %v923_v31 = vmul.f32 %v922_v29, %v3136_v13  ;;  %s1047_s23 = scvt.s32.f32 %s2360_s13  ;;  %v924_v32 = vmul.f32 %v922_v29, %v432_v16  ;;  %v925_v33 = vmul.f32 %v922_v29, %v3141_v14  ;;  %s3690_s26 = scalar_lea.vmem [#allocation3], %s2295_s25 }
  0x34   : > { %2594 = vmatpush3.bf16.msra.mxu0 %v3036_v1  ;;  %2602 = vmatpush3.bf16.msra.mxu1 %v3036_v1  ;;  %s2373_s16 = scalar_select %p1170_p5, 0, 1 }
  0x35   : > { %v1048_v34 = vstv %s1047_s23  ;;  %2607 = vmatprep.subr.bf16.mxu0 %v2891_v43  ;;  %2627 = vmatprep.subr.bf16.mxu1 %v2891_v43  ;;  %s2418_s27 = sshll.u32 %s2876_s21, 5  ;;  %s2192_s13 = sshll.u32 %s3690_s26, 4  ;;  %s3736_s13 = int_to_ptr.vmem [resolvable:$true] %s2192_s13 }
  0x36   : > { %s1173_s0 = scvt.s32.f32 %s2373_s16  ;;  %v1049_v35 = vmul.f32 %v1048_v34, %v3136_v13  ;;  %v1050_v36 = vmul.f32 %v1048_v34, %v432_v16  ;;  %v1051_v38 = vmul.f32 %v1048_v34, %v3141_v14  ;;  %s3744_s16 = scalar_lea.sflag [#allocation4], %s391_s15 }
  0x37   : > { %2596 = vmatmul.mubr.msk.bf16.vlgmr.msra.gmra.mrb[8].mxu0 %vm460_vm0, %v2778_v17  ;;  %2604 = vmatmul.mubr.msk.bf16.vlgmr.msra.gmra.mrb[8].mxu1 %vm460_vm0, %v2779_v21  ;;  %v404_v21 = vld [vmem:[%s3801_s5 + $0x8] sm:$0x7]  ;;  %s2893_s19 = smov [#allocation3]  }
  0x38   : > { %556 = vperm.xlu0 %2764, %v547_v22   ;;  %676 = vperm.xlu1 %2765, %v671_v23   ;;  %v1174_v37 = vstv %s1173_s0  ;;  %v3334_v22 = vrot.slane %v402_v2, %v1251_v3  ;;  %v3336_v23 = vrot.slane %v403_v10, %v1219_v63  ;;  %s2794_s0 = scalar_lea.vmem %s3736_s13, 512  ;;  %s2798_s12 = sshll.u32 %s2893_s19, 4  ;;  %s2799_s12 = int_to_ptr.vmem [resolvable:$false] %s2798_s12 }
  0x39   : > { %v1175_v39 = vmul.f32 %v1174_v37, %v3136_v13  ;;  %v1176_v40 = vmul.f32 %v1174_v37, %v432_v16  ;;  %v1177_v41 = vmul.f32 %v1174_v37, %v3141_v14  ;;  %2608 = vmatpush3.bf16.msra.mxu0 %v3211_v42  ;;  %2628 = vmatpush3.bf16.msra.mxu1 %v3211_v42  ;;  %p2795_p6 = scmp.ne.s32.totalorder %s3736_s13, %s2794_s0  ;;  %s2800_s28 = scalar_lea.vmem %s2799_s12, 1024 }
  0x3a   : > { %2609 = vmatprep.subr.bf16.mxu0 %v2891_v43  ;;  %2629 = vmatprep.subr.bf16.mxu1 %v2891_v43  ;;  %v3327_v16 = vrot.slane %v402_v2, %v1229_v0  ;;  %p2801_p10 = scmp.lt.s32.totalorder %s3736_s13, %s2799_s12  ;;  %p2802_p11 = scmp.lt.s32.totalorder %s2800_s28, %s2794_s0 }
  0x3b   : > { %2623 = vmatprep.mubr.msk.bf16.mxu0 %vm2892_vm1, %v2891_v43  ;;  %2643 = vmatprep.mubr.msk.bf16.mxu1 %vm2892_vm1, %v2891_v43  ;;  %p2796_p7 = pnand %p2795_p6, %p3007_p3 }
  0x3c   : > { %681 = vperm.xlu0 %2764, %v672_v24   ;;  %686 = vperm.xlu1 %2765, %v673_v25   ;;  %p2803_p12 = por %p2802_p11, %p2801_p10 }
  0x3d   : > { %2610 = vmatpush3.bf16.msra.mxu0 %v3222_v44  ;;  %2630 = vmatpush3.bf16.msra.mxu1 %v3222_v44  ;;  %p2797_p9 = pneg %p2796_p7 }
  0x3e   : > { %2611 = vmatprep.subr.bf16.mxu0 %v2891_v43  ;;  %2631 = vmatprep.subr.bf16.mxu1 %v2891_v43 }
  0x3f   : > { %p2804_p13 = pnand %p2803_p12, %p2797_p9 }
  0x40   : > { %802 = vperm.xlu0 %2764, %v797_v27   ;;  %807 = vperm.xlu1 %2765, %v798_v28   ;;  %v3341_v28 = vrot.slane %v403_v10, %v1229_v0 }
  0x41   : > { %2612 = vmatpush3.bf16.msra.mxu0 %v3231_v45  ;;  %2632 = vmatpush3.bf16.msra.mxu1 %v3231_v45 }
  0x42   : > { %2613 = vmatprep.subr.bf16.mxu0 %v2891_v43  ;;  %2633 = vmatprep.subr.bf16.mxu1 %v2891_v43 }
  0x44   : > { %812 = vperm.xlu0 %2764, %v799_v30   ;;  %928 = vperm.xlu1 %2765, %v923_v31  }
  0x45   : > { %2614 = vmatpush3.bf16.msra.mxu0 %v3239_v46  ;;  %2634 = vmatpush3.bf16.msra.mxu1 %v3239_v46 }
  0x46   : > { %2615 = vmatprep.subr.bf16.mxu0 %v2891_v43  ;;  %2635 = vmatprep.subr.bf16.mxu1 %v2891_v43 }
  0x48   : > { %933 = vperm.xlu0 %2764, %v924_v32   ;;  %938 = vperm.xlu1 %2765, %v925_v33   ;;  %v3345_v32 = vrot.slane %v403_v10, %v1251_v3 }
  0x49   : > { %2616 = vmatpush3.bf16.msra.mxu0 %v3251_v47  ;;  %2636 = vmatpush3.bf16.msra.mxu1 %v3251_v47 }
  0x4a   : > { %2617 = vmatprep.subr.bf16.mxu0 %v2891_v43  ;;  %2637 = vmatprep.subr.bf16.mxu1 %v2891_v43 }
  0x4c   : > { %1054 = vperm.xlu0 %2764, %v1049_v35   ;;  %1059 = vperm.xlu1 %2765, %v1050_v36   ;;  %v3348_v36 = vrot.slane %v404_v21, %v1219_v63 }
  0x4d   : > { %2618 = vmatpush3.bf16.msra.mxu0 %v3260_v48  ;;  %2638 = vmatpush3.bf16.msra.mxu1 %v3260_v48 }
  0x4e   : > { %2619 = vmatprep.subr.bf16.mxu0 %v2891_v43  ;;  %2639 = vmatprep.subr.bf16.mxu1 %v2891_v43 }
  0x50   : > { %1064 = vperm.xlu0 %2764, %v1051_v38   ;;  %1180 = vperm.xlu1 %2765, %v1175_v39  }
  0x51   : > { %2620 = vmatpush3.bf16.msra.mxu0 %v3269_v49  ;;  %2640 = vmatpush3.bf16.msra.mxu1 %v3269_v49 }
  0x52   : > { %2621 = vmatprep.subr.bf16.mxu0 %v2891_v43  ;;  %2641 = vmatprep.subr.bf16.mxu1 %v2891_v43 }
  0x54   : > { %1185 = vperm.xlu0 %2764, %v1176_v40   ;;  %1190 = vperm.xlu1 %2765, %v1177_v41   ;;  %v3353_v41 = vrot.slane %v404_v21, %v1229_v0 }
  0x55   : > { %2622 = vmatpush3.bf16.msra.mxu0 %v3278_v50  ;;  %2642 = vmatpush3.bf16.msra.mxu1 %v3278_v50 }
  0x56   : > { %2647 = vmatprep.subr.bf16.mxu0 %v2891_v43  ;;  %2667 = vmatprep.subr.bf16.mxu1 %v2891_v43 }
  0xb2   : > { %v562_v51 = vpop.permute.xlu1 %561  ;;  %v3286_v52 = vpop.permute.xlu0 %551 }
  0xb7   : > { %v3288_v53 = vpop.permute.xlu1 %676  ;;  %v3290_v54 = vpop.permute.xlu0 %556 }
  0xbb   : > { %v3292_v55 = vpop.permute.xlu1 %686  ;;  %v3294_v56 = vpop.permute.xlu0 %681 }
  0xbf   : > { %v3296_v57 = vpop.permute.xlu1 %807  ;;  %v3298_v59 = vpop.permute.xlu0 %802 }
  0xc3   : > { %v3300_v60 = vpop.permute.xlu1 %928  ;;  %v3307_v1 = vpop.permute.xlu0 %812 }
  0xc7   : > { %v3312_v4 = vpop.permute.xlu1 %938  ;;  %v3350_v37 = vpop.permute.xlu0 %933 }
  0xcb   : > { %v3355_v58 = vpop.permute.xlu1 %1059 }
  0xfa   : > { %v2565_v6 = vpop.f32.mrb[0].mxu0  ;;  %v2573_v8 = vpop.f32.mrb[0].mxu1 }
  0xfb   : > { %v523_v7 = vmul.f32 %v2565_v6, %v3305_v62  ;;  %v501_v9 = vpop.f32.mrb[1].mxu0  ;;  %v654_v11 = vmul.f32 %v2573_v8, %v3305_v62  ;;  %v638_v13 = vpop.f32.mrb[1].mxu1  ;;  %v3357_v8 = vrot.slane %v404_v21, %v1251_v3 }
  0xfc   : > { %v521_v12 = vmul.f32 %v3305_v62, %v501_v9  ;;  %v2566_v14 = vpop.f32.mrb[2].mxu0  ;;  %v652_v18 = vmul.f32 %v3305_v62, %v638_v13  ;;  %v2574_v19 = vpop.f32.mrb[2].mxu1 }
  0xfd   : > { %v532_v17 = vadd.f32 %v3317_v5, %v523_v7  ;;  %v504_v20 = vpop.f32.mrb[3].mxu0  ;;  %v657_v24 = vadd.f32 %v3317_v5, %v654_v11  ;;  %v641_v27 = vpop.f32.mrb[3].mxu1 }
  0xfe   : > { %v530_v25 = vadd.f32 %v3317_v5, %v521_v12  ;;  %v522_v26 = vmul.f32 %v3305_v62, %v504_v20  ;;  %v655_v30 = vadd.f32 %v3317_v5, %v652_v18  ;;  %v653_v31 = vmul.f32 %v3305_v62, %v641_v27 }
  0xff   : > { %v535_v29 = vmax.f32 %v532_v17, 0.0  ;;  %v660_v33 = vmax.f32 %v657_v24, 0.0 }
 0x100   : > { %v533_v34 = vmax.f32 %v530_v25, 0.0  ;;  %v531_v35 = vadd.f32 %v3317_v5, %v522_v26  ;;  %v658_v39 = vmax.f32 %v655_v30, 0.0  ;;  %v656_v40 = vadd.f32 %v3317_v5, %v653_v31 }
 0x101   : > { %v538_v38 = vmin.f32 %v535_v29, 6.0  ;;  %v663_v61 = vmin.f32 %v660_v33, 6.0 }
 0x102   : > { %v536_v2 = vmin.f32 %v533_v34, 6.0  ;;  %v534_v6 = vmax.f32 %v531_v35, 0.0  ;;  %v2581_v7 = vpop.f32.mrb[4].mxu0  ;;  %v661_v10 = vmin.f32 %v658_v39, 6.0  ;;  %v659_v63 = vmax.f32 %v656_v40, 0.0  ;;  %v2589_v12 = vpop.f32.mrb[4].mxu1 }
 0x103   : > { %v566_v9 = vmul.f32 %v562_v51, %v538_v38  ;;  %v780_v11 = vmul.f32 %v2581_v7, %v3305_v62  ;;  %v764_v13 = vpop.f32.mrb[5].mxu0  ;;  %v691_v14 = vmul.f32 %v3292_v55, %v663_v61  ;;  %v906_v18 = vmul.f32 %v2589_v12, %v3305_v62  ;;  %v890_v19 = vpop.f32.mrb[5].mxu1 }
 0x104   : > { %v564_v0 = vmul.f32 %v3286_v52, %v536_v2  ;;  %v537_v17 = vmin.f32 %v534_v6, 6.0  ;;  %v2582_v20 = vpop.f32.mrb[6].mxu0  ;;  %v689_v3 = vmul.f32 %v3288_v53, %v661_v10  ;;  %v662_v21 = vmin.f32 %v659_v63, 6.0  ;;  %v2590_v25 = vpop.f32.mrb[6].mxu1 }
 0x105   : > { %v2425_v24 = vpack.c.bf16 %v566_v9, %v566_v9  ;;  %v783_v51 = vadd.f32 %v3317_v5, %v780_v11  ;;  %v767_v26 = vpop.f32.mrb[7].mxu0  ;;  %v2428_v27 = vpack.c.bf16 %v691_v14, %v691_v14  ;;  %v909_v55 = vadd.f32 %v3317_v5, %v906_v18  ;;  %v893_v30 = vpop.f32.mrb[7].mxu1 }
 0x106   : > { %v565_v29 = vmul.f32 %v3290_v54, %v537_v17  ;;  %v778_v52 = vmul.f32 %v3305_v62, %v764_v13  ;;  %v2426_v31 = vpack.c.bf16 %v689_v3, %v689_v3  ;;  %v690_v33 = vmul.f32 %v3294_v56, %v662_v21  ;;  %v3374_v40 = vpop.permute.xlu0 %1054  ;;  %v3378_v7 = vpop.permute.xlu1 %1180 }
 0x107   : > { %582 = vst [vmem:[#allocation2 + $0x8] sm:$0x1] %v2425_v24  ;;  %v786_v34 = vmax.f32 %v783_v51, 0.0  ;;  %v904_v53 = vmul.f32 %v3305_v62, %v890_v19  ;;  %708 = vst [vmem:[#allocation2 + $0x14] sm:$0x1] %v2428_v27  ;;  %v912_v38 = vmax.f32 %v909_v55, 0.0  ;;  %v779_v54 = vmul.f32 %v3305_v62, %v767_v26 }
 0x108   : > { %v3370_v35 = vpack.c.bf16 %v565_v29, %v564_v0  ;;  %v781_v39 = vadd.f32 %v3317_v5, %v778_v52  ;;  %706 = vst [vmem:[#allocation2 + $0xc] sm:$0xf] %v2426_v31  ;;  %v2427_v61 = vpack.c.bf16 %v690_v33, %v690_v33  ;;  %v905_v56 = vmul.f32 %v3305_v62, %v893_v30 }
 0x109   : > { %v789_v2 = vmin.f32 %v786_v34, 6.0  ;;  %v907_v6 = vadd.f32 %v3317_v5, %v904_v53  ;;  %v915_v9 = vmin.f32 %v912_v38, 6.0  ;;  %v782_v63 = vadd.f32 %v3317_v5, %v779_v54 }
 0x10a   : > { %2454 = vst [vmem:[#allocation2] sm:$0xff] %v3370_v35   ;;  %v784_v10 = vmax.f32 %v781_v39, 0.0  ;;  %v2597_v11 = vpop.f32.mrb[8].mxu0  ;;  %v2467_v12 = vunpack.c.l.bf16 %v3370_v35  ;;  %707 = vst [vmem:[#allocation2 + $0x10] sm:$0xf] %v2427_v61  ;;  %v908_v0 = vadd.f32 %v3317_v5, %v905_v56  ;;  %v2605_v18 = vpop.f32.mrb[8].mxu1 }
 0x10b   : > { %v817_v13 = vmul.f32 %v3307_v1, %v789_v2  ;;  %v910_v14 = vmax.f32 %v907_v6, 0.0  ;;  %v1032_v17 = vmul.f32 %v2597_v11, %v3305_v62  ;;  %v1016_v19 = vpop.f32.mrb[9].mxu0  ;;  %v943_v20 = vmul.f32 %v3312_v4, %v915_v9  ;;  %v1142_v51 = vpop.f32.mrb[9].mxu1 }
 0x10c   : > { %v787_v24 = vmin.f32 %v784_v10, 6.0  ;;  %v785_v3 = vmax.f32 %v782_v63, 0.0  ;;  %v1158_v21 = vmul.f32 %v2605_v18, %v3305_v62  ;;  %v2598_v25 = vpop.f32.mrb[10].mxu0  ;;  %v911_v29 = vmax.f32 %v908_v0, 0.0  ;;  %v2606_v55 = vpop.f32.mrb[10].mxu1 }
 0x10d   : > { %v2431_v26 = vpack.c.bf16 %v817_v13, %v817_v13  ;;  %v913_v27 = vmin.f32 %v910_v14, 6.0  ;;  %v1035_v1 = vadd.f32 %v3317_v5, %v1032_v17  ;;  %v1019_v52 = vpop.f32.mrb[11].mxu0  ;;  %v2434_v30 = vpack.c.bf16 %v943_v20, %v943_v20  ;;  %v1145_v4 = vpop.f32.mrb[11].mxu1 }
 0x10e   : > { %v815_v31 = vmul.f32 %v3298_v59, %v787_v24  ;;  %v788_v33 = vmin.f32 %v785_v3, 6.0  ;;  %v1161_v34 = vadd.f32 %v3317_v5, %v1158_v21  ;;  %v914_v38 = vmin.f32 %v911_v29, 6.0  ;;  %v1191_v0 = vpop.permute.xlu1 %1190 }
 0x10f   : > { %834 = vst [vmem:[#allocation2 + $0x20] sm:$0x1] %v2431_v26  ;;  %v941_v53 = vmul.f32 %v3300_v60, %v913_v27  ;;  %v1038_v39 = vmax.f32 %v1035_v1, 0.0  ;;  %v1030_v54 = vmul.f32 %v3305_v62, %v1016_v19  ;;  %960 = vst [vmem:[#allocation2 + $0x2c] sm:$0x1] %v2434_v30  ;;  %v1156_v6 = vmul.f32 %v3305_v62, %v1142_v51  ;;  %v1065_v60 = vpop.permute.xlu0 %1064 }
 0x110   : > { %v816_v61 = vmul.f32 %v3296_v57, %v788_v33  ;;  %v1164_v2 = vmax.f32 %v1161_v34, 0.0  ;;  %v1031_v56 = vmul.f32 %v3305_v62, %v1019_v52  ;;  %v942_v9 = vmul.f32 %v3350_v37, %v914_v38  ;;  %v1225_v51 = vld [vmem:[#allocation2 + $0x8] sm:$0x1] }
 0x111   : > { %v2432_v59 = vpack.c.bf16 %v941_v53, %v941_v53  ;;  %v1041_v10 = vmin.f32 %v1038_v39, 6.0  ;;  %v1033_v63 = vadd.f32 %v3317_v5, %v1030_v54  ;;  %v1159_v14 = vadd.f32 %v3317_v5, %v1156_v6  ;;  %v1247_v1 = vld [vmem:[#allocation2] sm:$0xe]  ;;  %v1269_v6 = vld [vmem:[#allocation2 + $0xc] sm:$0xff]  }
 0x112   : > { %v3398_v11 = vpack.c.bf16 %v816_v61, %v815_v31  ;;  %v1167_v13 = vmin.f32 %v1164_v2, 6.0  ;;  %v1034_v57 = vadd.f32 %v3317_v5, %v1031_v56  ;;  %v2433_v17 = vpack.c.bf16 %v942_v9, %v942_v9 }
 0x113   : > { %958 = vst [vmem:[#allocation2 + $0x24] sm:$0xf] %v2432_v59  ;;  %v1069_v18 = vmul.f32 %v1065_v60, %v1041_v10  ;;  %v1036_v19 = vmax.f32 %v1033_v63, 0.0  ;;  %v1157_v20 = vmul.f32 %v3305_v62, %v1145_v4  ;;  %v1162_v24 = vmax.f32 %v1159_v14, 0.0  ;;  %v1186_v56 = vpop.permute.xlu0 %1185 }
 0x114   : > { %2459 = vst [vmem:[#allocation2 + $0x18] sm:$0xff] %v3398_v11   ;;  %v1195_v37 = vmul.f32 %v1191_v0, %v1167_v13  ;;  %v1037_v3 = vmax.f32 %v1034_v57, 0.0  ;;  %v2468_v21 = vunpack.c.h.bf16 %v3370_v35  ;;  %959 = vst [vmem:[#allocation2 + $0x28] sm:$0xf] %v2433_v17  ;;  %v1221_v29 = vmul.f32 %v2467_v12, %v3325_v15  ;;  %v1281_v0 = vld [vmem:[#allocation2 + $0x14] sm:$0x1] }
 0x115   : > { %v2437_v25 = vpack.c.bf16 %v1069_v18, %v1069_v18  ;;  %v1039_v26 = vmin.f32 %v1036_v19, 6.0  ;;  %v1160_v27 = vadd.f32 %v3317_v5, %v1157_v20  ;;  %v1165_v55 = vmin.f32 %v1162_v24, 6.0 }
 0x116   : > { %v2440_v62 = vpack.c.bf16 %v1195_v37, %v1195_v37  ;;  %v1040_v52 = vmin.f32 %v1037_v3, 6.0  ;;  %v1222_v30 = vmul.f32 %v2468_v21, %v3325_v15  ;;  %v1226_v34 = vunpack.c.l.bf16 %v1225_v51  ;;  %v1302_v37 = vld [vmem:[#allocation2 + $0xc] sm:$0xe] }
 0x117   : > { %1086 = vst [vmem:[#allocation2 + $0x38] sm:$0x1] %v2437_v25  ;;  %v1067_v31 = vmul.f32 %v3374_v40, %v1039_v26  ;;  %v1163_v33 = vmax.f32 %v1160_v27, 0.0  ;;  %v1231_v4 = vmul.f32 %v2467_v12, %v3327_v16  ;;  %v1193_v5 = vmul.f32 %v3378_v7, %v1165_v55 }
 0x118   : > { %1212 = vst [vmem:[#allocation2 + $0x44] sm:$0x1] %v2440_v62  ;;  %v1068_v53 = vmul.f32 %v3355_v58, %v1040_v52  ;;  %v1232_v38 = vmul.f32 %v2468_v21, %v3327_v16  ;;  %v1248_v39 = vunpack.c.l.bf16 %v1247_v1  ;;  %v1233_v61 = vmul.f32 %v3327_v16, %v1226_v34 }
 0x119   : > { %v1166_v54 = vmin.f32 %v1163_v33, 6.0  ;;  %v1238_v2 = vrot.slane %v1231_v4, 1  ;;  %v1254_v40 = vmul.f32 %v2468_v21, %v3334_v22  ;;  %v2438_v59 = vpack.c.bf16 %v1193_v5, %v1193_v5  ;;  %v1335_v4 = vld [vmem:[#allocation2 + $0x20] sm:$0x1] }
 0x11a   : > { %v3419_v9 = vpack.c.bf16 %v1068_v53, %v1067_v31  ;;  %v1239_v35 = vrot.slane %v1232_v38, 1  ;;  %v1253_v12 = vmul.f32 %v3334_v22, %v1248_v39  ;;  %v1241_v10 = vrot.slane %v1233_v61, 1 }
 0x11b   : > { %v1194_v7 = vmul.f32 %v1186_v56, %v1166_v54  ;;  %v1255_v58 = vmul.f32 %v3334_v22, %v1226_v34  ;;  %v1261_v63 = vrot.slane %v1254_v40, 2  ;;  %1210 = vst [vmem:[#allocation2 + $0x3c] sm:$0xf] %v2438_v59  ;;  %v1271_v14 = vunpack.c.l.bf16 %v1269_v6  ;;  %v1356_v5 = vld [vmem:[#allocation2 + $0x18] sm:$0xe] }
 0x11c   : > { %2464 = vst [vmem:[#allocation2 + $0x30] sm:$0xff] %v3419_v9   ;;  %v1240_v60 = vsel %vm1237_vm2, %v1238_v2, %v1239_v35  ;;  %v1260_v13 = vrot.slane %v1253_v12, 2  ;;  %v1272_v57 = vunpack.c.h.bf16 %v1269_v6  ;;  %v1242_v18 = vsel %vm1237_vm2, %v1239_v35, %v1241_v10 }
 0x11d   : > { %v2439_v17 = vpack.c.bf16 %v1194_v7, %v1194_v7  ;;  %v1245_v19 = vadd.f32 %v1240_v60, %v1221_v29  ;;  %v1263_v20 = vrot.slane %v1255_v58, 2  ;;  %v1246_v24 = vadd.f32 %v1242_v18, %v1222_v30 }
 0x11e   : > { %v1262_v3 = vsel %vm1259_vm3, %v1260_v13, %v1261_v63  ;;  %v1277_v21 = vmul.f32 %v3336_v23, %v1271_v14  ;;  %v1278_v51 = vmul.f32 %v3336_v23, %v1272_v57  ;;  %v1282_v27 = vunpack.c.l.bf16 %v1281_v0 }
 0x11f   : > { %1211 = vst [vmem:[#allocation2 + $0x40] sm:$0xf] %v2439_v17  ;;  %v1264_v25 = vsel %vm1259_vm3, %v1261_v63, %v1263_v20  ;;  %v1267_v26 = vadd.f32 %v1262_v3, %v1245_v19  ;;  %v1287_v1 = vmul.f32 %v3341_v28, %v1271_v14  ;;  %v1288_v55 = vmul.f32 %v3341_v28, %v1272_v57  ;;  %v1536_v19 = vld [vmem:[#allocation2 + $0xc] sm:$0xff]  }
 0x120   : > { %v1268_v62 = vadd.f32 %v1264_v25, %v1246_v24  ;;  %v1303_v29 = vunpack.c.l.bf16 %v1302_v37  ;;  %v1309_v52 = vmul.f32 %v3345_v32, %v1272_v57  ;;  %v1289_v31 = vmul.f32 %v3341_v28, %v1282_v27 }
 0x121   : > { %v1279_v30 = vadd.f32 %v1277_v21, %v1267_v26  ;;  %v1293_v33 = vrot.slane %v1287_v1, 1  ;;  %v1310_v34 = vmul.f32 %v3345_v32, %v1282_v27  ;;  %v1294_v38 = vrot.slane %v1288_v55, 1  ;;  %v1544_v21 = vld [vmem:[#allocation2 + $0x14] sm:$0x1] }
 0x122   : > { %v1280_v53 = vadd.f32 %v1278_v51, %v1268_v62  ;;  %v1308_v39 = vmul.f32 %v3345_v32, %v1303_v29  ;;  %v1315_v54 = vrot.slane %v1309_v52, 2  ;;  %v1296_v61 = vrot.slane %v1289_v31, 1 }
 0x123   : > { %v1317_v2 = vrot.slane %v1310_v34, 2  ;;  %v3437_v40 = vunpack.c.l.bf16 %v3398_v11  ;;  %v3440_v6 = vunpack.c.h.bf16 %v3398_v11  ;;  %v1295_v56 = vsel %vm1237_vm2, %v1293_v33, %v1294_v38  ;;  %v1561_v34 = vld [vmem:[#allocation2 + $0xc] sm:$0xe] }
 0x124   : > { %v1314_v59 = vrot.slane %v1308_v39, 2  ;;  %v1336_v35 = vunpack.c.l.bf16 %v1335_v4  ;;  %v1357_v12 = vunpack.c.l.bf16 %v1356_v5  ;;  %v1297_v7 = vsel %vm1237_vm2, %v1294_v38, %v1296_v61  ;;  %v3466_v39 = vld [vmem:[%s3802_s6] ss:$0 sm:$0xff] }
 0x125   : > { %v1300_v10 = vadd.f32 %v1295_v56, %v1279_v30  ;;  %v1318_v58 = vsel %vm1259_vm3, %v1315_v54, %v1317_v2  ;;  %v1331_v63 = vmul.f32 %v3437_v40, %v3348_v36  ;;  %v1301_v60 = vadd.f32 %v1297_v7, %v1280_v53 }
 0x126   : > { %v1316_v13 = vsel %vm1259_vm3, %v1314_v59, %v1315_v54  ;;  %v1332_v11 = vmul.f32 %v3440_v6, %v3348_v36  ;;  %v1341_v14 = vmul.f32 %v3437_v40, %v3353_v41  ;;  %v1342_v0 = vmul.f32 %v3440_v6, %v3353_v41 }
 0x127   : > { %v1321_v57 = vadd.f32 %v1316_v13, %v1300_v10  ;;  %v1343_v17 = vmul.f32 %v3353_v41, %v1336_v35  ;;  %v1362_v18 = vmul.f32 %v3357_v8, %v1357_v12  ;;  %v1322_v20 = vadd.f32 %v1318_v58, %v1301_v60  ;;  %v3476_v10 = vld [vmem:[%s3803_s7] ss:$0 sm:$0xff] }
 0x128   : > { %v1347_v37 = vrot.slane %v1341_v14, 1  ;;  %v1363_v24 = vmul.f32 %v3440_v6, %v3357_v8  ;;  %v1364_v3 = vmul.f32 %v3357_v8, %v1336_v35  ;;  %v1348_v25 = vrot.slane %v1342_v0, 1 }
 0x129   : > { %v1333_v51 = vadd.f32 %v1331_v63, %v1321_v57  ;;  %v1350_v26 = vrot.slane %v1343_v17, 1  ;;  %v1368_v27 = vrot.slane %v1362_v18, 2  ;;  %v1334_v1 = vadd.f32 %v1332_v11, %v1322_v20 }
 0x12a   : > { %v1369_v62 = vrot.slane %v1363_v24, 2  ;;  %v1371_v55 = vrot.slane %v1364_v3, 2  ;;  %v1538_v29 = vunpack.c.l.bf16 %v1536_v19  ;;  %v1349_v52 = vsel %vm1237_vm2, %v1347_v37, %v1348_v25  ;;  %v1586_v37 = vld [vmem:[#allocation2 + $0x20] sm:$0x1] }
 0x12b   : > { %v1351_v30 = vsel %vm1237_vm2, %v1348_v25, %v1350_v26  ;;  %v1539_v31 = vunpack.c.h.bf16 %v1536_v19  ;;  %v1545_v33 = vunpack.c.l.bf16 %v1544_v21  ;;  %v1354_v4 = vadd.f32 %v1349_v52, %v1333_v51  ;;  %v1603_v25 = vld [vmem:[#allocation2 + $0x18] sm:$0xe] }
 0x12c   : > { %v1355_v5 = vadd.f32 %v1351_v30, %v1334_v1  ;;  %v1370_v53 = vsel %vm1259_vm3, %v1368_v27, %v1369_v62  ;;  %v1372_v38 = vsel %vm1259_vm3, %v1369_v62, %v1371_v55  ;;  %v1540_v54 = vmul.f32 %v1538_v29, %v3325_v15 }
 0x12d   : > { %v1541_v61 = vmul.f32 %v1539_v31, %v3325_v15  ;;  %v1546_v2 = vmul.f32 %v1538_v29, %v3327_v16  ;;  %v1547_v56 = vmul.f32 %v1539_v31, %v3327_v16  ;;  %v1375_v59 = vadd.f32 %v1370_v53, %v1354_v4 }
 0x12e   : > { %v1376_v35 = vadd.f32 %v1372_v38, %v1355_v5  ;;  %v1548_v12 = vmul.f32 %v1545_v33, %v3327_v16  ;;  %v1562_v7 = vunpack.c.l.bf16 %v1561_v34  ;;  %v1564_v60 = vmul.f32 %v1539_v31, %v3334_v22 }
 0x12f   : > { %v1552_v58 = vrot.slane %v1546_v2, 1  ;;  %v1553_v63 = vrot.slane %v1547_v56, 1  ;;  %v1565_v13 = vmul.f32 %v1545_v33, %v3334_v22  ;;  %v1383_v11 = vmul.f32 %v3466_v39, %v1375_v59 }
 0x130   : > { %v1384_v14 = vmul.f32 %v3466_v39, %v1376_v35  ;;  %v1555_v57 = vrot.slane %v1548_v12, 1  ;;  %v1563_v0 = vmul.f32 %v1562_v7, %v3334_v22  ;;  %v1570_v18 = vrot.slane %v1564_v60, 2  ;;  %v1628_v60 = vld [vmem:[#allocation2 + $0x2c] sm:$0x1] }
 0x131   : > { %v1554_v17 = vsel %vm1237_vm2, %v1552_v58, %v1553_v63  ;;  %v1572_v19 = vrot.slane %v1565_v13, 2  ;;  %v1582_v20 = vmul.f32 %v3437_v40, %v3336_v23  ;;  %v1391_v24 = vadd.f32 %v3476_v10, %v1383_v11 }
 0x132   : > { %v1392_v3 = vadd.f32 %v3476_v10, %v1384_v14  ;;  %v1556_v21 = vsel %vm1237_vm2, %v1553_v63, %v1555_v57  ;;  %v1559_v51 = vadd.f32 %v1554_v17, %v1540_v54  ;;  %v1569_v27 = vrot.slane %v1563_v0, 2 }
 0x133   : > { %v1560_v26 = vadd.f32 %v1556_v21, %v1541_v61  ;;  %v1573_v1 = vsel %vm1259_vm3, %v1570_v18, %v1572_v19  ;;  %v1583_v62 = vmul.f32 %v3440_v6, %v3336_v23  ;;  %v1393_v55 = vmax.f32 %v1391_v24, 0.0  ;;  %v1620_v61 = vld [vmem:[#allocation2 + $0x24] sm:$0xff]  }
 0x134   : > { %v1394_v29 = vmax.f32 %v1392_v3, 0.0  ;;  %v1587_v52 = vunpack.c.l.bf16 %v1586_v37  ;;  %v1588_v30 = vmul.f32 %v3437_v40, %v3341_v28  ;;  %v1571_v31 = vsel %vm1259_vm3, %v1569_v27, %v1570_v18  ;;  %v1645_v37 = vld [vmem:[#allocation2 + $0x24] sm:$0xe] }
 0x135   : > { %v1577_v33 = vadd.f32 %v1573_v1, %v1560_v26  ;;  %v1589_v34 = vmul.f32 %v3440_v6, %v3341_v28  ;;  %v1604_v4 = vunpack.c.l.bf16 %v1603_v25  ;;  %v1395_v5 = vmin.f32 %v1393_v55, 6.0 }
 0x136   : > { %v1396_v53 = vmin.f32 %v1394_v29, 6.0  ;;  %v1576_v38 = vadd.f32 %v1571_v31, %v1559_v51  ;;  %v1590_v54 = vmul.f32 %v1587_v52, %v3341_v28  ;;  %v1594_v56 = vrot.slane %v1588_v30, 1 }
 0x137   : > { %v1585_v2 = vadd.f32 %v1583_v62, %v1577_v33  ;;  %v1595_v59 = vrot.slane %v1589_v34, 1  ;;  %v1605_v35 = vmul.f32 %v1604_v4, %v3345_v32  ;;  %v1606_v63 = vmul.f32 %v3440_v6, %v3345_v32 }
 0x138   : > { %v1397_v12 = vpack.c.bf16 %v1396_v53, %v1395_v5  ;;  %v1584_v7 = vadd.f32 %v1582_v20, %v1576_v38  ;;  %v1597_v58 = vrot.slane %v1590_v54, 1  ;;  %v1607_v11 = vmul.f32 %v1587_v52, %v3345_v32  ;;  %v1757_v38 = vld [vmem:[#allocation2 + $0x20] sm:$0x1] }
 0x139   : > { %v1596_v13 = vsel %vm1237_vm2, %v1594_v56, %v1595_v59  ;;  %v1611_v14 = vrot.slane %v1605_v35, 2  ;;  %v1622_v57 = vunpack.c.l.bf16 %v1620_v61  ;;  %v1612_v18 = vrot.slane %v1606_v63, 2 }
 0x13a   : > { %2624 = vmatmul.mubr.bf16.vlgmr.msra.gmra.mrb[12].mxu0 %v1397_v12  ;;  %v1598_v0 = vsel %vm1237_vm2, %v1595_v59, %v1597_v58  ;;  %v1601_v17 = vadd.f32 %v1596_v13, %v1584_v7  ;;  %v1623_v19 = vunpack.c.h.bf16 %v1620_v61  ;;  %v1614_v24 = vrot.slane %v1607_v11, 2  ;;  %v1774_v59 = vld [vmem:[#allocation2 + $0x18] sm:$0xe] }
 0x13b   : > { %2648 = vmatpush3.bf16.msra.mxu0 %v3211_v42  ;;  %v1602_v20 = vadd.f32 %v1598_v0, %v1585_v2  ;;  %v1624_v3 = vmul.f32 %v1622_v57, %v3348_v36  ;;  %v1629_v21 = vunpack.c.l.bf16 %v1628_v60  ;;  %2663 = vmatprep.mubr.msk.bf16.mxu0 %vm2892_vm1, %v2891_v43  ;;  %v1613_v51 = vsel %vm1259_vm3, %v1611_v14, %v1612_v18 }
 0x13c   : > { %v1625_v25 = vmul.f32 %v1623_v19, %v3348_v36  ;;  %v1630_v26 = vmul.f32 %v1622_v57, %v3353_v41  ;;  %v1631_v27 = vmul.f32 %v1623_v19, %v3353_v41  ;;  %2649 = vmatprep.subr.bf16.mxu0 %v2891_v43  ;;  %v1615_v1 = vsel %vm1259_vm3, %v1612_v18, %v1614_v24  ;;  %v1791_v18 = vld [vmem:[#allocation2 + $0x24] sm:$0xff]  }
 0x13d   : > { %v1618_v62 = vadd.f32 %v1613_v51, %v1601_v17  ;;  %v1632_v55 = vmul.f32 %v1629_v21, %v3353_v41  ;;  %v1646_v29 = vunpack.c.l.bf16 %v1645_v37  ;;  %v1619_v52 = vadd.f32 %v1615_v1, %v1602_v20 }
 0x13e   : > { %v1636_v30 = vrot.slane %v1630_v26, 1  ;;  %v1637_v31 = vrot.slane %v1631_v27, 1  ;;  %v1648_v33 = vmul.f32 %v1623_v19, %v3357_v8  ;;  %v1649_v53 = vmul.f32 %v1629_v21, %v3357_v8 }
 0x13f   : > { %v1626_v34 = vadd.f32 %v1624_v3, %v1618_v62  ;;  %v1639_v4 = vrot.slane %v1632_v55, 1  ;;  %v1647_v5 = vmul.f32 %v1646_v29, %v3357_v8  ;;  %2650 = vmatpush3.bf16.msra.mxu0 %v3222_v44  ;;  %v1627_v54 = vadd.f32 %v1625_v25, %v1619_v52 }
 0x140   : > { %v1638_v61 = vsel %vm1237_vm2, %v1636_v30, %v1637_v31  ;;  %v1654_v2 = vrot.slane %v1648_v33, 2  ;;  %2651 = vmatprep.subr.bf16.mxu0 %v2891_v43  ;;  %v1753_v56 = vmul.f32 %v3437_v40, %v3325_v15  ;;  %v1656_v58 = vrot.slane %v1649_v53, 2  ;;  %v1799_v33 = vld [vmem:[#allocation2 + $0x2c] sm:$0x1] }
 0x141   : > { %v1640_v35 = vsel %vm1237_vm2, %v1637_v31, %v1639_v4  ;;  %v1643_v12 = vadd.f32 %v1638_v61, %v1626_v34  ;;  %v1653_v7 = vrot.slane %v1647_v5, 2  ;;  %v1754_v60 = vmul.f32 %v3440_v6, %v3325_v15 }
 0x142   : > { %v1644_v63 = vadd.f32 %v1640_v35, %v1627_v54  ;;  %v1758_v13 = vunpack.c.l.bf16 %v1757_v38  ;;  %v1759_v11 = vmul.f32 %v3437_v40, %v3327_v16  ;;  %v1657_v57 = vsel %vm1259_vm3, %v1654_v2, %v1656_v58 }
 0x143   : > { %v1655_v14 = vsel %vm1259_vm3, %v1653_v7, %v1654_v2  ;;  %2652 = vmatpush3.bf16.msra.mxu0 %v3231_v45  ;;  %v1760_v0 = vmul.f32 %v3440_v6, %v3327_v16  ;;  %v1775_v17 = vunpack.c.l.bf16 %v1774_v59  ;;  %v1777_v21 = vmul.f32 %v3440_v6, %v3334_v22  ;;  %v1816_v2 = vld [vmem:[#allocation2 + $0x24] sm:$0xe] }
 0x144   : > { %v1660_v19 = vadd.f32 %v1655_v14, %v1643_v12  ;;  %v1661_v37 = vadd.f32 %v1657_v57, %v1644_v63  ;;  %2653 = vmatprep.subr.bf16.mxu0 %v2891_v43  ;;  %v1761_v20 = vmul.f32 %v1758_v13, %v3327_v16  ;;  %v1765_v24 = vrot.slane %v1759_v11, 1 }
 0x145   : > { %v1766_v3 = vrot.slane %v1760_v0, 1  ;;  %v1776_v40 = vmul.f32 %v1775_v17, %v3334_v22  ;;  %v1778_v45 = vmul.f32 %v1758_v13, %v3334_v22  ;;  %v1793_v27 = vunpack.c.l.bf16 %v1791_v18  ;;  %v1841_v0 = vld [vmem:[#allocation2 + $0x38] sm:$0x1] }
 0x146   : > { %v1662_v51 = vmul.f32 %v3466_v39, %v1660_v19  ;;  %v1663_v25 = vmul.f32 %v3466_v39, %v1661_v37  ;;  %v1768_v26 = vrot.slane %v1761_v20, 1  ;;  %v1783_v55 = vrot.slane %v1777_v21, 2 }
 0x147   : > { %2654 = vmatpush3.bf16.msra.mxu0 %v3239_v46  ;;  %v1767_v1 = vsel %vm1237_vm2, %v1765_v24, %v1766_v3  ;;  %v1782_v62 = vrot.slane %v1776_v40, 2  ;;  %v1785_v29 = vrot.slane %v1778_v45, 2  ;;  %v1794_v5 = vunpack.c.h.bf16 %v1791_v18 }
 0x148   : > { %v1664_v52 = vadd.f32 %v3476_v10, %v1662_v51  ;;  %v1665_v30 = vadd.f32 %v3476_v10, %v1663_v25  ;;  %2655 = vmatprep.subr.bf16.mxu0 %v2891_v43  ;;  %v1769_v6 = vsel %vm1237_vm2, %v1766_v3, %v1768_v26  ;;  %v1772_v31 = vadd.f32 %v1767_v1, %v1753_v56  ;;  %v1858_v25 = vld [vmem:[#allocation2 + $0x30] sm:$0xe] }
 0x149   : > { %v1773_v34 = vadd.f32 %v1769_v6, %v1754_v60  ;;  %v1784_v4 = vsel %vm1259_vm3, %v1782_v62, %v1783_v55  ;;  %v1786_v46 = vsel %vm1259_vm3, %v1783_v55, %v1785_v29  ;;  %v1795_v61 = vmul.f32 %v1793_v27, %v3336_v23 }
 0x14a   : > { %v1666_v53 = vmax.f32 %v1664_v52, 0.0  ;;  %v1667_v38 = vmax.f32 %v1665_v30, 0.0  ;;  %v1789_v54 = vadd.f32 %v1784_v4, %v1772_v31  ;;  %v1796_v35 = vmul.f32 %v1794_v5, %v3336_v23  ;;  %v1962_v31 = vld [vmem:[#allocation2 + $0x24] sm:$0xff]  }
 0x14b   : > { %2656 = vmatpush3.bf16.msra.mxu0 %v3251_v47  ;;  %v1790_v59 = vadd.f32 %v1786_v46, %v1773_v34  ;;  %v1800_v12 = vunpack.c.l.bf16 %v1799_v33  ;;  %v1801_v56 = vmul.f32 %v1793_v27, %v3341_v28  ;;  %v1802_v60 = vmul.f32 %v1794_v5, %v3341_v28 }
 0x14c   : > { %v1668_v7 = vmin.f32 %v1666_v53, 6.0  ;;  %v1669_v58 = vmin.f32 %v1667_v38, 6.0  ;;  %2657 = vmatprep.subr.bf16.mxu0 %v2891_v43  ;;  %v1797_v63 = vadd.f32 %v1795_v61, %v1789_v54  ;;  %v1817_v57 = vunpack.c.l.bf16 %v1816_v2 }
 0x14d   : > { %v1798_v13 = vadd.f32 %v1796_v35, %v1790_v59  ;;  %v1803_v11 = vmul.f32 %v1800_v12, %v3341_v28  ;;  %v1807_v14 = vrot.slane %v1801_v56, 1  ;;  %v1808_v17 = vrot.slane %v1802_v60, 1  ;;  %v1970_v35 = vld [vmem:[#allocation2 + $0x2c] sm:$0x1] }
 0x14e   : > { %v1670_v47 = vpack.c.bf16 %v1669_v58, %v1668_v7  ;;  %v1819_v18 = vmul.f32 %v1794_v5, %v3345_v32  ;;  %v1820_v19 = vmul.f32 %v1800_v12, %v3345_v32  ;;  %v1818_v20 = vmul.f32 %v1817_v57, %v3345_v32 }
 0x14f   : > { %2658 = vmatpush3.bf16.msra.mxu0 %v3260_v48  ;;  %v1810_v37 = vrot.slane %v1803_v11, 1  ;;  %v3561_v24 = vunpack.c.l.bf16 %v3419_v9  ;;  %v3564_v3 = vunpack.c.h.bf16 %v3419_v9  ;;  %v1809_v40 = vsel %vm1237_vm2, %v1807_v14, %v1808_v17  ;;  %v1987_v11 = vld [vmem:[#allocation2 + $0x24] sm:$0xe]  ;;  %v2788_v14 = vld [vmem:[%s3804_s8 + $0x10] sm:$0xff]  }
 0x150   : > { %2644 = vmatmul.mubr.bf16.vlgmr.msra.gmra.mrb[12].mxu1 %v1670_v47  ;;  %2659 = vmatprep.subr.bf16.mxu0 %v2891_v43  ;;  %v1825_v21 = vrot.slane %v1819_v18, 2  ;;  %v1827_v45 = vrot.slane %v1820_v19, 2  ;;  %v1842_v51 = vunpack.c.l.bf16 %v1841_v0  ;;  %v1814_v26 = vadd.f32 %v1809_v40, %v1797_v63 }
 0x151   : > { %2668 = vmatpush3.bf16.msra.mxu1 %v3211_v42  ;;  %v1811_v48 = vsel %vm1237_vm2, %v1808_v17, %v1810_v37  ;;  %v1824_v27 = vrot.slane %v1818_v20, 2  ;;  %v1837_v1 = vmul.f32 %v3561_v24, %v3348_v36  ;;  %2683 = vmatprep.mubr.msk.bf16.mxu1 %vm2892_vm1, %v2891_v43  ;;  %v1838_v55 = vmul.f32 %v3564_v3, %v3348_v36 }
 0x152   : > { %2669 = vmatprep.subr.bf16.mxu1 %v2891_v43  ;;  %v1815_v9 = vadd.f32 %v1811_v48, %v1798_v13  ;;  %v1828_v62 = vsel %vm1259_vm3, %v1825_v21, %v1827_v45  ;;  %v1843_v42 = vmul.f32 %v3561_v24, %v3353_v41  ;;  %v1844_v52 = vmul.f32 %v3564_v3, %v3353_v41 }
 0x153   : > { %2660 = vmatpush3.bf16.msra.mxu0 %v3269_v49  ;;  %v1826_v29 = vsel %vm1259_vm3, %v1824_v27, %v1825_v21  ;;  %v1845_v30 = vmul.f32 %v1842_v51, %v3353_v41  ;;  %v1859_v6 = vunpack.c.l.bf16 %v1858_v25  ;;  %v1861_v46 = vmul.f32 %v3564_v3, %v3357_v8  ;;  %v2789_v27 = vld [vmem:[%s3804_s8 + $0x18] sm:$0xff]  }
 0x154   : > { %2661 = vmatprep.subr.bf16.mxu0 %v2891_v43  ;;  %v1831_v33 = vadd.f32 %v1826_v29, %v1814_v26  ;;  %v1832_v34 = vadd.f32 %v1828_v62, %v1815_v9  ;;  %v1849_v4 = vrot.slane %v1843_v42, 1  ;;  %v1850_v49 = vrot.slane %v1844_v52, 1  ;;  %v2012_v52 = vld [vmem:[#allocation2 + $0x38] sm:$0x1] }
 0x155   : > { %2670 = vmatpush3.bf16.msra.mxu1 %v3222_v44  ;;  %v1852_v5 = vrot.slane %v1845_v30, 1  ;;  %v1860_v53 = vmul.f32 %v1859_v6, %v3357_v8  ;;  %v1862_v38 = vmul.f32 %v1842_v51, %v3357_v8  ;;  %v1867_v2 = vrot.slane %v1861_v46, 2 }
 0x156   : > { %2671 = vmatprep.subr.bf16.mxu1 %v2891_v43  ;;  %v1839_v54 = vadd.f32 %v1837_v1, %v1831_v33  ;;  %v1840_v61 = vadd.f32 %v1838_v55, %v1832_v34  ;;  %v1964_v59 = vunpack.c.l.bf16 %v1962_v31  ;;  %v1851_v12 = vsel %vm1237_vm2, %v1849_v4, %v1850_v49 }
 0x157   : > { %2662 = vmatpush3.bf16.msra.mxu0 %v3278_v50  ;;  %v1853_v56 = vsel %vm1237_vm2, %v1850_v49, %v1852_v5  ;;  %v1866_v44 = vrot.slane %v1860_v53, 2  ;;  %v1869_v7 = vrot.slane %v1862_v38, 2  ;;  %v1965_v60 = vunpack.c.h.bf16 %v1962_v31  ;;  %v2029_v49 = vld [vmem:[#allocation2 + $0x30] sm:$0xe]  ;;  %v2790_v5 = vld [vmem:[%s3804_s8 + $0x20] sm:$0xff]  }
 0x158   : > { %v1856_v58 = vadd.f32 %v1851_v12, %v1839_v54  ;;  %v1857_v63 = vadd.f32 %v1853_v56, %v1840_v61  ;;  %v1966_v13 = vmul.f32 %v1964_v59, %v3325_v15  ;;  %v1971_v0 = vunpack.c.l.bf16 %v1970_v35 }
 0x159   : > { %2672 = vmatpush3.bf16.msra.mxu1 %v2788_v14  ;;  %v1868_v57 = vsel %vm1259_vm3, %v1866_v44, %v1867_v2  ;;  %v1870_v50 = vsel %vm1259_vm3, %v1867_v2, %v1869_v7  ;;  %v1972_v47 = vmul.f32 %v1964_v59, %v3327_v16  ;;  %v1967_v19 = vmul.f32 %v1965_v60, %v3325_v15  ;;  %v2791_v14 = vld [vmem:[%s3804_s8 + $0x28] sm:$0xff]  }
 0x15a   : > { %2673 = vmatprep.subr.bf16.mxu1 %v2891_v43  ;;  %v1873_v17 = vadd.f32 %v1868_v57, %v1856_v58  ;;  %v1874_v18 = vadd.f32 %v1870_v50, %v1857_v63  ;;  %v1973_v37 = vmul.f32 %v1965_v60, %v3327_v16  ;;  %v1974_v20 = vmul.f32 %v1971_v0, %v3327_v16  ;;  %v2046_v58 = vld [vmem:[#allocation2 + $0x3c] sm:$0xff]  }
 0x15b   : > { %v1978_v40 = vrot.slane %v1972_v47, 1  ;;  %v1988_v21 = vunpack.c.l.bf16 %v1987_v11  ;;  %v1990_v45 = vmul.f32 %v1965_v60, %v3334_v22  ;;  %v1991_v26 = vmul.f32 %v1971_v0, %v3334_v22  ;;  %v2054_v11 = vld [vmem:[#allocation2 + $0x44] sm:$0x1] }
 0x15c   : > { %v1875_v51 = vmul.f32 %v3466_v39, %v1873_v17  ;;  %v1876_v25 = vmul.f32 %v3466_v39, %v1874_v18  ;;  %v1979_v48 = vrot.slane %v1973_v37, 1  ;;  %v1981_v15 = vrot.slane %v1974_v20, 1 }
 0x15d   : > { %2674 = vmatpush3.bf16.msra.mxu1 %v2789_v27  ;;  %v1989_v1 = vmul.f32 %v1988_v21, %v3334_v22  ;;  %v1996_v16 = vrot.slane %v1990_v45, 2  ;;  %v2008_v9 = vmul.f32 %v3561_v24, %v3336_v23  ;;  %v1998_v29 = vrot.slane %v1991_v26, 2  ;;  %v2071_v21 = vld [vmem:[#allocation2 + $0x3c] sm:$0xe] }
 0x15e   : > { %2675 = vmatprep.subr.bf16.mxu1 %v2891_v43  ;;  %v1877_v62 = vadd.f32 %v3476_v10, %v1875_v51  ;;  %v1878_v55 = vadd.f32 %v3476_v10, %v1876_v25  ;;  %v1980_v42 = vsel %vm1237_vm2, %v1978_v40, %v1979_v48  ;;  %v1982_v30 = vsel %vm1237_vm2, %v1979_v48, %v1981_v15  ;;  %v2792_v48 = vld [vmem:[%s3804_s8 + $0x30] sm:$0xff]  }
 0x15f   : > { %v1985_v6 = vadd.f32 %v1980_v42, %v1966_v13  ;;  %v1995_v31 = vrot.slane %v1989_v1, 2  ;;  %v2009_v22 = vmul.f32 %v3564_v3, %v3336_v23  ;;  %v1986_v4 = vadd.f32 %v1982_v30, %v1967_v19 }
 0x160   : > { %v1879_v33 = vmax.f32 %v1877_v62, 0.0  ;;  %v1880_v34 = vmax.f32 %v1878_v55, 0.0  ;;  %v1999_v46 = vsel %vm1259_vm3, %v1996_v16, %v1998_v29  ;;  %v2013_v38 = vunpack.c.l.bf16 %v2012_v52 }
 0x161   : > { %2676 = vmatpush3.bf16.msra.mxu1 %v2790_v5  ;;  %v1997_v53 = vsel %vm1259_vm3, %v1995_v31, %v1996_v16  ;;  %v2014_v54 = vmul.f32 %v3561_v24, %v3341_v28  ;;  %v2015_v23 = vmul.f32 %v3564_v3, %v3341_v28  ;;  %v2003_v35 = vadd.f32 %v1999_v46, %v1986_v4 }
 0x162   : > { %2677 = vmatprep.subr.bf16.mxu1 %v2891_v43  ;;  %v1881_v61 = vmin.f32 %v1879_v33, 6.0  ;;  %v1882_v2 = vmin.f32 %v1880_v34, 6.0  ;;  %v2002_v59 = vadd.f32 %v1997_v53, %v1985_v6  ;;  %v2016_v12 = vmul.f32 %v2013_v38, %v3341_v28 }
 0x163   : > { %v2020_v56 = vrot.slane %v2014_v54, 1  ;;  %v2021_v44 = vrot.slane %v2015_v23, 1  ;;  %v2030_v7 = vunpack.c.l.bf16 %v2029_v49  ;;  %v2011_v13 = vadd.f32 %v2009_v22, %v2003_v35 }
 0x164   : > { %v1883_v63 = vpack.c.bf16 %v1882_v2, %v1881_v61  ;;  %v2010_v60 = vadd.f32 %v2008_v9, %v2002_v59  ;;  %v2032_v24 = vmul.f32 %v3564_v3, %v3345_v32  ;;  %v2023_v50 = vrot.slane %v2016_v12, 1 }
 0x165   : > { %2678 = vmatpush3.bf16.msra.mxu1 %v2791_v14  ;;  %v2022_v57 = vsel %vm1237_vm2, %v2020_v56, %v2021_v44  ;;  %v2031_v28 = vmul.f32 %v2030_v7, %v3345_v32  ;;  %v2033_v0 = vmul.f32 %v2013_v38, %v3345_v32  ;;  %v2048_v18 = vunpack.c.l.bf16 %v2046_v58  ;;  %v2389_v7 = vld [vmem:[%s3061_s29 + $0xc] sm:$0xff]  }
 0x166   : > { %2679 = vmatprep.subr.bf16.mxu1 %v2891_v43  ;;  %2664 = vmatmul.mubr.bf16.vlgmr.msra.gmra.mrb[16].mxu0 %v1883_v63  ;;  %v2027_v47 = vadd.f32 %v2022_v57, %v2010_v60  ;;  %v2038_v17 = vrot.slane %v2032_v24, 2  ;;  %v2049_v3 = vunpack.c.h.bf16 %v2046_v58  ;;  %v2024_v19 = vsel %vm1237_vm2, %v2021_v44, %v2023_v50  ;;  %v2391_v58 = vld [vmem:[%s3061_s29 + $0x14] sm:$0x1] }
 0x167   : > { %v2037_v37 = vrot.slane %v2031_v28, 2  ;;  %v2040_v20 = vrot.slane %v2033_v0, 2  ;;  %v2055_v40 = vunpack.c.l.bf16 %v2054_v11  ;;  %v2028_v45 = vadd.f32 %v2024_v19, %v2011_v13  ;;  %v3679_v11 = vld [vmem:[%s3806_s10] ss:$0 sm:$0xff] }
 0x168   : > { %v2050_v51 = vmul.f32 %v2048_v18, %v3348_v36  ;;  %v2051_v25 = vmul.f32 %v2049_v3, %v3348_v36  ;;  %v2056_v32 = vmul.f32 %v2048_v18, %v3353_v41  ;;  %v2057_v15 = vmul.f32 %v2049_v3, %v3353_v41 }
 0x169   : > { %2680 = vmatpush3.bf16.msra.mxu1 %v2792_v48  ;;  %v2039_v26 = vsel %vm1259_vm3, %v2037_v37, %v2038_v17  ;;  %v2041_v27 = vsel %vm1259_vm3, %v2038_v17, %v2040_v20  ;;  %v2058_v1 = vmul.f32 %v2055_v40, %v3353_v41  ;;  %v2072_v62 = vunpack.c.l.bf16 %v2071_v21  ;;  %v2793_v41 = vld [vmem:[%s3804_s8 + $0x38] sm:$0xff]  }
 0x16a   : > { %2681 = vmatprep.subr.bf16.mxu1 %v2891_v43  ;;  %v2044_v16 = vadd.f32 %v2039_v26, %v2027_v47  ;;  %v2045_v9 = vadd.f32 %v2041_v27, %v2028_v45  ;;  %v2062_v36 = vrot.slane %v2056_v32, 1  ;;  %v2063_v55 = vrot.slane %v2057_v15, 1  ;;  %v2497_v26 = vld [vmem:[%s3061_s29 + $0x18] sm:$0xff]   ;;  %v2396_v27 = vld [vmem:[%s3061_s29 + $0x20] sm:$0x1] }
 0x16b   : > { %v2065_v42 = vrot.slane %v2058_v1, 1  ;;  %v2074_v29 = vmul.f32 %v2049_v3, %v3357_v8  ;;  %v2075_v52 = vmul.f32 %v2055_v40, %v3357_v8  ;;  %v2073_v31 = vmul.f32 %v2072_v62, %v3357_v8 }
 0x16c   : > { %v2052_v30 = vadd.f32 %v2050_v51, %v2044_v16  ;;  %v2053_v6 = vadd.f32 %v2051_v25, %v2045_v9  ;;  %v2064_v43 = vsel %vm1237_vm2, %v2062_v36, %v2063_v55  ;;  %v1506_v63 = vunpack.c.l.bf16 %v2389_v7 }
 0x16d   : > { %2682 = vmatpush3.bf16.msra.mxu1 %v2793_v41  ;;  %v2066_v22 = vsel %vm1237_vm2, %v2063_v55, %v2065_v42  ;;  %v2080_v33 = vrot.slane %v2074_v29, 2  ;;  %v2082_v34 = vrot.slane %v2075_v52, 2  ;;  %v2079_v49 = vrot.slane %v2073_v31, 2 }
 0x16e   : > { %v2069_v4 = vadd.f32 %v2064_v43, %v2052_v30  ;;  %v2070_v46 = vadd.f32 %v2066_v22, %v2053_v6  ;;  %v1507_v60 = vunpack.c.h.bf16 %v2389_v7  ;;  %v1508_v13 = vunpack.c.l.bf16 %v2391_v58 }
 0x16f   : > { %v2083_v5 = vsel %vm1259_vm3, %v2080_v33, %v2082_v34  ;;  %v2081_v8 = vsel %vm1259_vm3, %v2079_v49, %v2080_v33  ;;  %v1512_v24 = vrot.slane %v1506_v63, 1  ;;  %v2479_v15 = vunpack.c.l.bf16 %v2497_v26 }
 0x170   : > { %v2087_v53 = vadd.f32 %v2083_v5, %v2070_v46  ;;  %v2086_v38 = vadd.f32 %v2081_v8, %v2069_v4  ;;  %v1515_v57 = vrot.slane %v1508_v13, 1  ;;  %v2480_v1 = vunpack.c.h.bf16 %v2497_v26 }
 0x171   : > { %v1721_v16 = vunpack.c.l.bf16 %v2396_v27  ;;  %v1725_v9 = vrot.slane %v2479_v15, 1 }
 0x172   : > { %v2089_v54 = vmul.f32 %v3466_v39, %v2087_v53  ;;  %v2088_v23 = vmul.f32 %v3466_v39, %v2086_v38  ;;  %v3674_v39 = vld [vmem:[%s3805_s9] ss:$0 sm:$0xff]  ;;  %v1726_v36 = vrot.slane %v2480_v1, 1  ;;  %v2401_v38 = vld [vmem:[%s3061_s29 + $0x24] sm:$0xff]  }
 0x173   : > { %v1728_v55 = vrot.slane %v1721_v16, 1 }
 0x174   : > { %v2091_v61 = vadd.f32 %v3476_v10, %v2089_v54  ;;  %v2090_v2 = vadd.f32 %v3476_v10, %v2088_v23  ;;  %v1513_v10 = vrot.slane %v1507_v60, 1  ;;  %v1727_v52 = vsel %vm1237_vm2, %v1725_v9, %v1726_v36  ;;  %v2403_v54 = vld [vmem:[%s3061_s29 + $0x2c] sm:$0x1] }
 0x175   : > { %v1729_v43 = vsel %vm1237_vm2, %v1726_v36, %v1728_v55  ;;  %v1932_v23 = vunpack.c.l.bf16 %v2401_v38 }
 0x176   : > { %v2093_v59 = vmax.f32 %v2091_v61, 0.0  ;;  %v2092_v35 = vmax.f32 %v2090_v2, 0.0  ;;  %v1514_v0 = vsel %vm1237_vm2, %v1512_v24, %v1513_v10  ;;  %v1516_v19 = vsel %vm1237_vm2, %v1513_v10, %v1515_v57 }
 0x177   : > { %v1933_v61 = vunpack.c.h.bf16 %v2401_v38  ;;  %v1934_v2 = vunpack.c.l.bf16 %v2403_v54 }
 0x178   : > { %v2095_v12 = vmin.f32 %v2093_v59, 6.0  ;;  %v2094_v56 = vmin.f32 %v2092_v35, 6.0  ;;  %v1938_v59 = vrot.slane %v1932_v23, 1 }
 0x179   : > { %v1939_v35 = vrot.slane %v1933_v61, 1 }
 0x17a   : > { %v2096_v44 = vpack.c.bf16 %v2095_v12, %v2094_v56  ;;  %v1941_v56 = vrot.slane %v1934_v2, 1 }
 0x17b   : > { %v1940_v58 = vsel %vm1237_vm2, %v1938_v59, %v1939_v35 }
 0x17c   : > { %2684 = vmatmul.mubr.bf16.vlgmr.msra.gmra.mrb[16].mxu1 %v2096_v44  ;;  %v1942_v10 = vsel %vm1237_vm2, %v1939_v35, %v1941_v56 }
 0x20d   : > { %v1480_v14 = vpop.f32.mrb[12].mxu0 }
 0x20e   : > { %v1493_v50 = vmul.f32 %v3674_v39, %v1480_v14  ;;  %v2625_v28 = vpop.f32.mrb[13].mxu0 }
 0x20f   : > { %v1483_v47 = vpop.f32.mrb[14].mxu0 }
 0x210   : > { %v1501_v17 = vadd.f32 %v3679_v11, %v1493_v50  ;;  %v1494_v18 = vmul.f32 %v3674_v39, %v1483_v47  ;;  %v2626_v3 = vpop.f32.mrb[15].mxu0 }
 0x212   : > { %v1519_v37 = vadd.f32 %v1514_v0, %v1501_v17  ;;  %v1502_v20 = vadd.f32 %v3679_v11, %v1494_v18 }
 0x214   : > { %v1521_v40 = vmax.f32 %v1519_v37, 0.0  ;;  %v1520_v21 = vadd.f32 %v1516_v19, %v1502_v20  ;;  %v2498_v19 = vld [vmem:[%s3061_s29 + $0x30] sm:$0xff]   ;;  %v2410_v37 = vld [vmem:[%s3061_s29 + $0x38] sm:$0x1]  ;;  %s2449_s29 = sshll.u32 %s2872_s20, 3 }
 0x215   : > { %v2495_v20 = vunpack.c.l.bf16 %v2498_v19  ;;  %s2189_s14 = sadd.s32 %s2449_s29, %s2418_s27 }
 0x216   : > { %v1523_v45 = vmin.f32 %v1521_v40, 6.0  ;;  %v1522_v51 = vmax.f32 %v1520_v21, 0.0  ;;  %v2496_v40 = vunpack.c.h.bf16 %v2498_v19  ;;  %v2147_v21 = vunpack.c.l.bf16 %v2410_v37  ;;  %s2419_s2 = sshll.u32 %s2189_s14, 6 }
 0x217   : > { %s3734_s21 = scalar_lea.hbm %s3807_s11, %s2419_s2 }
 0x218   : > { %v2441_v25 = vpack.c.bf16 %v1523_v45, %v1523_v45  ;;  %v1524_v32 = vmin.f32 %v1522_v51, 6.0  ;;  %v2151_v45 = vrot.slane %v2495_v20, 1  ;;  %v2152_v51 = vrot.slane %v2496_v40, 1 }
 0x21a   : > { %1534 = vst.msk [vmem:[%s3690_s26] sm:$0xf] %vm1533_vm4, %v2441_v25  ;;  %v2442_v48 = vpack.c.bf16 %v1524_v32, %v1524_v32  ;;  %v2154_v32 = vrot.slane %v2147_v21, 1  ;;  %v2153_v27 = vsel %vm1237_vm2, %v2151_v45, %v2152_v51 }
 0x21c   : > { %1535 = vst.msk [vmem:[%s3690_s26 + $0x4] sm:$0xf] %vm1533_vm4, %v2442_v48  ;;  %v2155_v36 = vsel %vm1237_vm2, %v2152_v51, %v2154_v32 }
 0x223   : > { %v1705_v62 = vpop.f32.mrb[12].mxu1 }
 0x224   : > { %v1712_v42 = vmul.f32 %v3674_v39, %v1705_v62  ;;  %v2645_v29 = vpop.f32.mrb[13].mxu1 }
 0x225   : > { %v1708_v30 = vpop.f32.mrb[14].mxu1 }
 0x226   : > { %v1714_v6 = vadd.f32 %v3679_v11, %v1712_v42  ;;  %v1713_v31 = vmul.f32 %v3674_v39, %v1708_v30  ;;  %v2646_v41 = vpop.f32.mrb[15].mxu1 }
 0x228   : > { %v1732_v22 = vadd.f32 %v1727_v52, %v1714_v6  ;;  %v1715_v33 = vadd.f32 %v3679_v11, %v1713_v31 }
 0x22a   : > { %v1734_v34 = vmax.f32 %v1732_v22, 0.0  ;;  %v1733_v4 = vadd.f32 %v1729_v43, %v1715_v33 }
 0x22c   : > { %v1736_v46 = vmin.f32 %v1734_v34, 6.0  ;;  %v1735_v49 = vmax.f32 %v1733_v4, 0.0 }
 0x22e   : > { %v2443_v5 = vpack.c.bf16 %v1736_v46, %v1736_v46  ;;  %v1737_v8 = vmin.f32 %v1735_v49, 6.0 }
 0x230   : > { %2399 = vst.msk [vmem:[%s3690_s26 + $0x8] sm:$0xf] %vm1533_vm4, %v2443_v5  ;;  %v2444_v53 = vpack.c.bf16 %v1737_v8, %v1737_v8 }
 0x232   : > { %2400 = vst.msk [vmem:[%s3690_s26 + $0xc] sm:$0xf] %vm1533_vm4, %v2444_v53 }
 0x239   : > { %v1918_v12 = vpop.f32.mrb[16].mxu0 }
 0x23a   : > { %v1925_v44 = vmul.f32 %v3674_v39, %v1918_v12  ;;  %v2665_v7 = vpop.f32.mrb[17].mxu0 }
 0x23b   : > { %v1921_v63 = vpop.f32.mrb[18].mxu0 }
 0x23c   : > { %v1927_v60 = vadd.f32 %v3679_v11, %v1925_v44  ;;  %v1926_v13 = vmul.f32 %v3674_v39, %v1921_v63  ;;  %v2666_v24 = vpop.f32.mrb[19].mxu0 }
 0x23e   : > { %v1945_v14 = vadd.f32 %v1940_v58, %v1927_v60  ;;  %v1928_v57 = vadd.f32 %v3679_v11, %v1926_v13 }
 0x240   : > { %v1947_v50 = vmax.f32 %v1945_v14, 0.0  ;;  %v1946_v28 = vadd.f32 %v1942_v10, %v1928_v57 }
 0x242   : > { %v1949_v0 = vmin.f32 %v1947_v50, 6.0  ;;  %v1948_v47 = vmax.f32 %v1946_v28, 0.0 }
 0x244   : > { %v2445_v17 = vpack.c.bf16 %v1949_v0, %v1949_v0  ;;  %v1950_v18 = vmin.f32 %v1948_v47, 6.0 }
 0x246   : > { %2406 = vst.msk [vmem:[%s3690_s26 + $0x10] sm:$0xf] %vm1533_vm4, %v2445_v17  ;;  %v2446_v3 = vpack.c.bf16 %v1950_v18, %v1950_v18 }
 0x248   : > { %2407 = vst.msk [vmem:[%s3690_s26 + $0x14] sm:$0xf] %vm1533_vm4, %v2446_v3 }
 0x24f   : > { %v2131_v25 = vpop.f32.mrb[16].mxu1 }
 0x250   : > { %v2138_v48 = vmul.f32 %v3674_v39, %v2131_v25  ;;  %v2685_v26 = vpop.f32.mrb[17].mxu1 }
 0x251   : > { %v2134_v15 = vpop.f32.mrb[18].mxu1 }
 0x252   : > { %v2140_v1 = vadd.f32 %v3679_v11, %v2138_v48  ;;  %v2139_v16 = vmul.f32 %v3674_v39, %v2134_v15  ;;  %v2686_v9 = vpop.f32.mrb[19].mxu1 }
 0x254   : > { %v2158_v62 = vadd.f32 %v2153_v27, %v2140_v1  ;;  %v2141_v55 = vadd.f32 %v3679_v11, %v2139_v16 }
 0x256   : > { %v2160_v42 = vmax.f32 %v2158_v62, 0.0  ;;  %v2159_v29 = vadd.f32 %v2155_v36, %v2141_v55 }
 0x258   : > { %v2162_v52 = vmin.f32 %v2160_v42, 6.0  ;;  %v2161_v30 = vmax.f32 %v2159_v29, 0.0 }
 0x25a   : > { %v2447_v39 = vpack.c.bf16 %v2162_v52, %v2162_v52  ;;  %v2163_v6 = vmin.f32 %v2161_v30, 6.0 }
 0x25c   : > { %2413 = vst.msk [vmem:[%s3690_s26 + $0x18] sm:$0xf] %vm1533_vm4, %v2447_v39  ;;  %v2448_v11 = vpack.c.bf16 %v2163_v6, %v2163_v6 }
 0x25e   : > { %2414 = vst.msk [vmem:[%s3690_s26 + $0x1c] sm:$0xf] %vm1533_vm4, %v2448_v11 }
 0x25f   : > { %2807 = shalt.err (!%p2804_p13)
}
 0x260   : > { %s2808_s22 = scalar_lea.hbm %s3734_s21, 512  ;;  %s2812_s26 = scalar_lea.hbm %s3807_s11, 4096 }
 0x261   : > { %p2809_p0 = scmp.ne.s32.totalorder %s3734_s21, %s2808_s22  ;;  %p2813_p4 = scmp.lt.u32.totalorder %s3734_s21, %s3807_s11 }
 0x262   : > { %p2814_p5 = scmp.lt.u32.totalorder %s2812_s26, %s2808_s22  ;;  %p2816_p7 = scmp.lt.u32.totalorder %s2808_s22, %s3734_s21 }
 0x263   : > { %p2810_p1 = pnand %p2809_p0, %p3007_p3 }
 0x264   : > { %p2815_p6 = por %p2814_p5, %p2813_p4 }
 0x265   : > { %p2811_p2 = pneg %p2810_p1 }
 0x266   : > { %p2817_p9 = por %p2816_p7, %p2815_p6 }
 0x268   : > { %p2818_p10 = pnand %p2817_p9, %p2811_p2 }
 0x26a   : > { %2821 = shalt.err (!%p2818_p10)
}
 0x26b   : > { %s2894_s14 = smov 64   ;;  %s2895_s2 = smov 4  }
 0x26c   : > { %2688 = dma.vmem_to_hbm [thread:$0]  (%p3007_p3), %s3736_s13, 512, %s3734_s21, %s3744_s16, %s2894_s14, %s2894_s14, %s2895_s2  }
 0x26d PF: > { %p2694_p11 = scmp.ge.s32.totalorder %s2888_s24, 2  ;;  %s2207_s23 = sand.u32 1, %s2860_s17  }
 0x26e   : > { %s2208_s0 = scalar_lea.sflag [#allocation4], %s2207_s23 }
 0x26f   : > { %p2691_p12 = pnand %p2694_p11, %p3016_p8 }
 0x271   : > { %2855 = dma.done.wait (!%p2691_p12), %s2208_s0, 512  }
 0x272   : > { %2857 = vsyncadd (!%p2691_p12), %s2208_s0, 4294966784  ;;  %s24_s24 = sadd.s32 1, %s2888_s24   ;;  %s3839_s19 = sld [smem:[#allocation6_spill]] }
 0x273   : > { %p21_p13 = scmp.ge.s32.totalorder %s24_s24, 10   ;;  %s3840_s12 = sld [smem:[#allocation12_spill]] }
 0x274   : > { %s3841_s20 = sld [smem:[#allocation7_spill]]  ;;  %s3842_s21 = sld [smem:[#allocation8_spill]] }
 0x275   : > { %s3843_s22 = sld [smem:[#allocation9_spill]]  ;;  %s3844_s23 = sld [smem:[#allocation10_spill]] }
 0x276   : > { %s3845_s17 = smov %s2864_s18  ;;  %23 = sbr.rel (!%p21_p13) target bundleno = 8 (0x8), region = 113 }
 0x278   : > { %s3846_s18 = smov %s3839_s19 }
 0x279   : > { %s3847_s19 = smov %s3840_s12 }
 0x27d   :  { %2213 = vsyncpa [#allocation4], 1 }
 0x27e   :  { %2215 = vsyncpa [#allocation4 + $0x1], 1 }

</bundles_post_ra>
